<compile_context>
chip_gen: v6e
topology: v6e:2x2x1
jax: 0.10.0
libtpu: 0.0.40
codegen_flags: <defaults>
</compile_context>

<pallas_src>
import functools

import jax
import jax.numpy as jnp
import numpy as np
from jax.experimental import pallas as pl
from jax.experimental.pallas import tpu as pltpu

# spike_args used by the reference implementation
THRESH = 0.5
LENS = 0.5     # surrogate-gradient width (backward only; unused in forward)
DECAY = 0.2


def _rfc_kernel(x_ref, wfc_ref, bfc_ref, wrec_ref, brec_ref,
                spk_out_ref, mem_out_ref, sum_out_ref,
                ff_s,
                *, T, decay, thresh, xishuspike, xishuada):
    bb = x_ref.shape[1]
    d_in = x_ref.shape[2]
    d_out = wrec_ref.shape[1]
    mm_dtype = wfc_ref.dtype

    # ---- hoisted feed-forward matmul: one MXU pass for the whole window ----
    # (T, bb, D_in) -> (T*bb, D_in): no recurrent dependence, so it runs at
    # full MXU row utilization instead of T tiny M=bb matmuls.
    x_all = x_ref[...].reshape(T * bb, d_in).astype(mm_dtype)
    ff_all = jnp.dot(x_all, wfc_ref[...], preferred_element_type=jnp.float32)
    ff_s[...] = (ff_all + bfc_ref[...]).reshape(T, bb, d_out)

    # resident weights / bias for the recurrent path (loaded once)
    wrec = wrec_ref[...]
    brec = brec_ref[...]

    zeros = jnp.zeros((bb, d_out), jnp.float32)

    def step(t, carry):
        mem, spike, adap, ssum = carry
        # adaptive threshold update (uses the previous spike)
        adap = 0.9 * adap + xishuspike * spike
        # feed-forward membrane: precomputed ff + leaky reset term
        mem_ff = mem * decay * (1.0 - spike) + ff_s[t] - adap * xishuada
        spike_ff = (mem_ff > thresh).astype(jnp.float32)
        # recurrent membrane: previous spikes through the (pre-masked) weights
        mem_r = jnp.dot(spike.astype(mm_dtype), wrec,
                        preferred_element_type=jnp.float32) + brec
        spike_r = (mem_r > thresh).astype(jnp.float32)
        mem = mem_ff + mem_r
        spike = spike_ff + spike_r          # 0, 1 or 2, exactly as in PyTorch
        ssum = ssum + spike
        # per-step return value of forward(): lane-dense (bb, 128) store into
        # the VMEM-resident trace block
        spk_out_ref[t] = spike.astype(spk_out_ref.dtype)
        return mem, spike, adap, ssum

    mem, spike, adap, ssum = jax.lax.fori_loop(
        0, T, step, (zeros, zeros, zeros, zeros), unroll=True)

    # final-state outputs: written once per batch tile
    mem_out_ref[...] = mem
    sum_out_ref[...] = ssum


def prepare_rfc_params(fc_weight, fc_bias, rec_weight, rec_bias, rec_mask,
                       matmul_dtype=jnp.bfloat16):
    """One-time layout/precision prep (kept out of the per-window hot path).

    fc_weight:  (D_out, D_in)   PyTorch nn.Linear layout
    rec_weight: (D_out, D_out)
    rec_mask:   (D_out, D_out)  0/1 mask; masking is idempotent so applied once.
    Returns (wfc^T, b_fc, masked wrec^T, b_rec) in kernel layout.
    """
    d_out = fc_weight.shape[0]
    wfc = jnp.transpose(fc_weight).astype(matmul_dtype)                # (D_in, D_out)
    wrec = jnp.transpose(rec_weight * rec_mask).astype(matmul_dtype)   # (D_out, D_out)
    bfc = fc_bias.reshape(1, d_out).astype(jnp.float32)
    brec = rec_bias.reshape(1, d_out).astype(jnp.float32)
    return wfc, bfc, wrec, brec


def rfc_block_forward(x_tbi, wfc, bfc, wrec, brec,
                      *, decay=DECAY, thresh=THRESH,
                      xishuspike=0.5, xishuada=0.1, block_b=None):
    """Runs the whole spike window (T steps) inside one pallas_call.

    x_tbi: (T, B, D_in) per-timestep input (onoffnoise == 'off' path)
    wfc/bfc/wrec/brec: outputs of prepare_rfc_params
    returns (spike_trace (T, B, D_out), mem_final (B, D_out), sumspike (B, D_out))
    """
    T, B, D_in = x_tbi.shape
    D_out = wrec.shape[1]
    if block_b is None:
        block_b = B                       # full batch per tile at these sizes
    assert B % block_b == 0, "batch must be divisible by the batch tile"
    assert block_b % 8 == 0, "batch tile must be a multiple of 8 (sublanes)"
    nb = B // block_b

    kernel = functools.partial(_rfc_kernel, T=T, decay=decay, thresh=thresh,
                               xishuspike=xishuspike, xishuada=xishuada)

    out_shapes = (
        jax.ShapeDtypeStruct((T, B, D_out), jnp.float32),   # spike at every step
        jax.ShapeDtypeStruct((B, D_out), jnp.float32),      # final mem
        jax.ShapeDtypeStruct((B, D_out), jnp.float32),      # final sumspike
    )

    spike_trace, mem_final, sumspike = pl.pallas_call(
        kernel,
        out_shape=out_shapes,
        grid=(nb,),
        in_specs=[
            pl.BlockSpec((T, block_b, D_in), lambda b: (0, b, 0)),   # full x window
            pl.BlockSpec((D_in, D_out), lambda b: (0, 0)),           # W_fc^T
            pl.BlockSpec((1, D_out), lambda b: (0, 0)),              # b_fc
            pl.BlockSpec((D_out, D_out), lambda b: (0, 0)),          # masked W_rec^T
            pl.BlockSpec((1, D_out), lambda b: (0, 0)),              # b_rec
        ],
        out_specs=(
            pl.BlockSpec((T, block_b, D_out), lambda b: (0, b, 0)),  # spike trace
            pl.BlockSpec((block_b, D_out), lambda b: (b, 0)),        # final mem
            pl.BlockSpec((block_b, D_out), lambda b: (b, 0)),        # final sumspike
        ),
        scratch_shapes=[pltpu.VMEM((T, block_b, D_out), jnp.float32)],  # hoisted ff
        compiler_params=pltpu.CompilerParams(
            dimension_semantics=("parallel",)),
    )(x_tbi, wfc, bfc, wrec, brec)

    return spike_trace, mem_final, sumspike


# TODO(synk): add_noise (onoffnoise == 'on') uses torch.rand per call; only the
# deterministic 'off' path is implemented.  TrainingHook / FA_wrapper only alter
# gradients (identity in forward), and self.act is never applied in
# RFC_block.forward, so both are intentionally omitted.


def _reference_window(x_tbi, fc_weight, fc_bias, rec_weight, rec_bias, rec_mask,
                      *, decay=DECAY, thresh=THRESH,
                      xishuspike=0.5, xishuada=0.1):
    """Pure-JAX reference matching the PyTorch forward (for verification)."""
    T, B, _ = x_tbi.shape
    D_out = fc_weight.shape[0]
    w_rec_m = rec_weight * rec_mask
    mem = jnp.zeros((B, D_out), jnp.float32)
    spike = jnp.zeros((B, D_out), jnp.float32)
    adap = jnp.zeros((B, D_out), jnp.float32)
    sumspike = jnp.zeros((B, D_out), jnp.float32)
    spikes = []
    for t in range(T):
        x = x_tbi[t]
        adap = 0.9 * adap + xishuspike * spike
        ff = jnp.dot(x, fc_weight.T,
                     precision=jax.lax.Precision.HIGHEST) + fc_bias
        mem_ff = mem * decay * (1.0 - spike) + ff - adap * xishuada
        spike_ff = (mem_ff > thresh).astype(jnp.float32)
        mem_r = jnp.dot(spike, w_rec_m.T,
                        precision=jax.lax.Precision.HIGHEST) + rec_bias
        spike_r = (mem_r > thresh).astype(jnp.float32)
        mem = mem_ff + mem_r
        spike = spike_ff + spike_r
        sumspike = sumspike + spike
        spikes.append(spike)
    return jnp.stack(spikes), mem, sumspike


if __name__ == "__main__":
    key = jax.random.PRNGKey(0)
    kx, kwf, kbf, kwr, kbr, kmask = jax.random.split(key, 6)

    # RFC_block(in_features=128, out_features=128, bias=True, activation='none',
    #           batch_size=16, spike_window=8, xishuspike=0.5, xishuada=0.1, ...)
    T, B, D_in, D_out = 8, 16, 128, 128

    # Inputs / weights quantized to multiples of 1/8 so they are exactly
    # representable in bf16 and both matmul paths (bf16 MXU with f32 accumulate
    # vs f32 HIGHEST reference) are bit-exact -> spike thresholds cannot flip
    # due to precision.
    x = jax.random.randint(kx, (T, B, D_in), -2, 3).astype(jnp.float32) * 0.5
    fc_weight = jax.random.randint(kwf, (D_out, D_in), -2, 3).astype(jnp.float32) * 0.125
    fc_bias = jax.random.randint(kbf, (D_out,), -2, 3).astype(jnp.float32) * 0.125
    rec_weight = jax.random.randint(kwr, (D_out, D_out), -1, 2).astype(jnp.float32) * 0.125
    rec_bias = jax.random.randint(kbr, (D_out,), -2, 3).astype(jnp.float32) * 0.125

    # rec_mask: off-diagonal ones with a random 50% of entries zeroed
    # (deterministic here; the PyTorch module uses np.random at construction).
    off_diag = 1.0 - jnp.eye(D_out, dtype=jnp.float32)
    drop = (jax.random.uniform(kmask, (D_out, D_out)) < 0.5).astype(jnp.float32)
    rec_mask = off_diag * (1.0 - drop)

    # One-time weight prep (outside the per-window hot path).
    wfc, bfc, wrec, brec = prepare_rfc_params(
        fc_weight, fc_bias, rec_weight, rec_bias, rec_mask,
        matmul_dtype=jnp.bfloat16)

    spike_trace, mem_final, sumspike = rfc_block_forward(x, wfc, bfc, wrec, brec)
    spike_trace = jax.block_until_ready(spike_trace)
    mem_final = jax.block_until_ready(mem_final)
    sumspike = jax.block_until_ready(sumspike)

    ref_trace, ref_mem, ref_sum = _reference_window(
        x, fc_weight, fc_bias, rec_weight, rec_bias, rec_mask)

    np.testing.assert_allclose(np.asarray(spike_trace), np.asarray(ref_trace),
                               atol=1e-6)
    np.testing.assert_allclose(np.asarray(mem_final), np.asarray(ref_mem),
                               rtol=1e-5, atol=1e-5)
    np.testing.assert_allclose(np.asarray(sumspike), np.asarray(ref_sum),
                               atol=1e-6)

    print("KERNEL_OK")
</pallas_src>

<mosaic_0001>
module attributes {stable_mosaic.version = 11 : i64} {
  func.func @_rfc_kernel(%arg0: i32, %arg1: memref<8x16x128xf32, #tpu.memory_space<vmem>>, %arg2: memref<128x128xbf16, #tpu.memory_space<vmem>>, %arg3: memref<1x128xf32, #tpu.memory_space<vmem>>, %arg4: memref<128x128xbf16, #tpu.memory_space<vmem>>, %arg5: memref<1x128xf32, #tpu.memory_space<vmem>>, %arg6: memref<8x16x128xf32, #tpu.memory_space<vmem>>, %arg7: memref<16x128xf32, #tpu.memory_space<vmem>>, %arg8: memref<16x128xf32, #tpu.memory_space<vmem>>, %arg9: memref<8x16x128xf32, #tpu.memory_space<vmem>>) attributes {dimension_semantics = [#tpu.dimension_semantics<parallel>], iteration_bounds = array<i64: 1>, scalar_prefetch = 0 : i64, scratch_operands = 1 : i64, tpu.core_type = #tpu.core_type<tc>, window_params = [{transform_indices = @transform_0, window_bounds = array<i64: 8, 16, 128>}, {pipeline_mode = #tpu.pipeline_mode<synchronous>, transform_indices = @transform_1, window_bounds = array<i64: 128, 128>}, {pipeline_mode = #tpu.pipeline_mode<synchronous>, transform_indices = @transform_2, window_bounds = array<i64: 1, 128>}, {pipeline_mode = #tpu.pipeline_mode<synchronous>, transform_indices = @transform_3, window_bounds = array<i64: 128, 128>}, {pipeline_mode = #tpu.pipeline_mode<synchronous>, transform_indices = @transform_4, window_bounds = array<i64: 1, 128>}, {transform_indices = @transform_5, window_bounds = array<i64: 8, 16, 128>}, {transform_indices = @transform_6, window_bounds = array<i64: 16, 128>}, {transform_indices = @transform_7, window_bounds = array<i64: 16, 128>}]} {
    %c0 = arith.constant 0 : index
    %c0_0 = arith.constant 0 : index
    %c0_1 = arith.constant 0 : index
    %0 = vector.load %arg1[%c0, %c0_0, %c0_1] : memref<8x16x128xf32, #tpu.memory_space<vmem>>, vector<8x16x128xf32>
    %1 = vector.shape_cast %0 : vector<8x16x128xf32> to vector<128x128xf32>
    %2 = arith.truncf %1 : vector<128x128xf32> to vector<128x128xbf16>
    %c0_2 = arith.constant 0 : index
    %c0_3 = arith.constant 0 : index
    %3 = vector.load %arg2[%c0_2, %c0_3] : memref<128x128xbf16, #tpu.memory_space<vmem>>, vector<128x128xbf16>
    %cst = arith.constant dense<0.000000e+00> : vector<128x128xf32>
    %4 = tpu.matmul %2, %3, %cst {dimension_numbers = #tpu.dot_dimension_numbers<[1], [0], [0], [1], [0, 0, 1, 1], [], []>} : vector<128x128xbf16>, vector<128x128xbf16>, vector<128x128xf32> -> vector<128x128xf32>
    %c0_4 = arith.constant 0 : index
    %c0_5 = arith.constant 0 : index
    %5 = vector.load %arg3[%c0_4, %c0_5] : memref<1x128xf32, #tpu.memory_space<vmem>>, vector<1x128xf32>
    %6 = vector.broadcast %5 : vector<1x128xf32> to vector<128x128xf32>
    %7 = arith.addf %4, %6 : vector<128x128xf32>
    %8 = vector.shape_cast %7 : vector<128x128xf32> to vector<8x16x128xf32>
    %c0_6 = arith.constant 0 : index
    %c0_7 = arith.constant 0 : index
    %c0_8 = arith.constant 0 : index
    %9 = vector.load %arg9[%c0_6, %c0_7, %c0_8] : memref<8x16x128xf32, #tpu.memory_space<vmem>>, vector<8x16x128xf32>
    tpu.vector_store %arg9[%c0_6, %c0_7, %c0_8], %8 {strides = array<i32>} : memref<8x16x128xf32, #tpu.memory_space<vmem>>, vector<8x16x128xf32>,
    %c0_9 = arith.constant 0 : index
    %c0_10 = arith.constant 0 : index
    %10 = vector.load %arg4[%c0_9, %c0_10] : memref<128x128xbf16, #tpu.memory_space<vmem>>, vector<128x128xbf16>
    %c0_11 = arith.constant 0 : index
    %c0_12 = arith.constant 0 : index
    %11 = vector.load %arg5[%c0_11, %c0_12] : memref<1x128xf32, #tpu.memory_space<vmem>>, vector<1x128xf32>
    %cst_13 = arith.constant 0.000000e+00 : f32
    %12 = vector.broadcast %cst_13 : f32 to vector<16x128xf32>
    %c0_i32 = arith.constant 0 : i32
    %cst_14 = arith.constant 0.899999976 : f32
    %13 = vector.broadcast %cst_14 : f32 to vector<16x128xf32>
    %14 = arith.mulf %13, %12 : vector<16x128xf32>
    %cst_15 = arith.constant 5.000000e-01 : f32
    %15 = vector.broadcast %cst_15 : f32 to vector<16x128xf32>
    %16 = arith.mulf %15, %12 : vector<16x128xf32>
    %17 = arith.addf %14, %16 : vector<16x128xf32>
    %cst_16 = arith.constant 2.000000e-01 : f32
    %18 = vector.broadcast %cst_16 : f32 to vector<16x128xf32>
    %19 = arith.mulf %12, %18 : vector<16x128xf32>
    %cst_17 = arith.constant 1.000000e+00 : f32
    %20 = vector.broadcast %cst_17 : f32 to vector<16x128xf32>
    %21 = arith.subf %20, %12 : vector<16x128xf32>
    %22 = arith.mulf %19, %21 : vector<16x128xf32>
    %23 = arith.index_cast %c0_i32 : i32 to index
    %c0_18 = arith.constant 0 : index
    %c0_19 = arith.constant 0 : index
    %24 = vector.load %arg9[%23, %c0_18, %c0_19] : memref<8x16x128xf32, #tpu.memory_space<vmem>>, vector<1x16x128xf32>
    %25 = vector.shape_cast %24 : vector<1x16x128xf32> to vector<16x128xf32>
    %26 = arith.addf %22, %25 : vector<16x128xf32>
    %cst_20 = arith.constant 1.000000e-01 : f32
    %27 = vector.broadcast %cst_20 : f32 to vector<16x128xf32>
    %28 = arith.mulf %17, %27 : vector<16x128xf32>
    %29 = arith.subf %26, %28 : vector<16x128xf32>
    %cst_21 = arith.constant 5.000000e-01 : f32
    %30 = vector.broadcast %cst_21 : f32 to vector<16x128xf32>
    %31 = arith.cmpf ogt, %29, %30 : vector<16x128xf32>
    %32 = arith.extui %31 : vector<16x128xi1> to vector<16x128xi32>
    %33 = arith.sitofp %32 : vector<16x128xi32> to vector<16x128xf32>
    %34 = arith.truncf %12 : vector<16x128xf32> to vector<16x128xbf16>
    %cst_22 = arith.constant dense<0.000000e+00> : vector<16x128xf32>
    %35 = tpu.matmul %34, %10, %cst_22 {dimension_numbers = #tpu.dot_dimension_numbers<[1], [0], [0], [1], [0, 0, 1, 1], [], []>} : vector<16x128xbf16>, vector<128x128xbf16>, vector<16x128xf32> -> vector<16x128xf32>
    %36 = vector.broadcast %11 : vector<1x128xf32> to vector<16x128xf32>
    %37 = arith.addf %35, %36 : vector<16x128xf32>
    %cst_23 = arith.constant 5.000000e-01 : f32
    %38 = vector.broadcast %cst_23 : f32 to vector<16x128xf32>
    %39 = arith.cmpf ogt, %37, %38 : vector<16x128xf32>
    %40 = arith.extui %39 : vector<16x128xi1> to vector<16x128xi32>
    %41 = arith.sitofp %40 : vector<16x128xi32> to vector<16x128xf32>
    %42 = arith.addf %29, %37 : vector<16x128xf32>
    %43 = arith.addf %33, %41 : vector<16x128xf32>
    %44 = arith.addf %12, %43 : vector<16x128xf32>
    %45 = arith.index_cast %c0_i32 : i32 to index
    %c0_24 = arith.constant 0 : index
    %c0_25 = arith.constant 0 : index
    %46 = vector.load %arg6[%45, %c0_24, %c0_25] : memref<8x16x128xf32, #tpu.memory_space<vmem>>, vector<1x16x128xf32>
    %47 = vector.shape_cast %46 : vector<1x16x128xf32> to vector<16x128xf32>
    %48 = vector.shape_cast %43 : vector<16x128xf32> to vector<1x16x128xf32>
    tpu.vector_store %arg6[%45, %c0_24, %c0_25], %48 {strides = array<i32>} : memref<8x16x128xf32, #tpu.memory_space<vmem>>, vector<1x16x128xf32>,
    %c1_i32 = arith.constant 1 : i32
    %cst_26 = arith.constant 0.899999976 : f32
    %49 = vector.broadcast %cst_26 : f32 to vector<16x128xf32>
    %50 = arith.mulf %49, %17 : vector<16x128xf32>
    %cst_27 = arith.constant 5.000000e-01 : f32
    %51 = vector.broadcast %cst_27 : f32 to vector<16x128xf32>
    %52 = arith.mulf %51, %43 : vector<16x128xf32>
    %53 = arith.addf %50, %52 : vector<16x128xf32>
    %cst_28 = arith.constant 2.000000e-01 : f32
    %54 = vector.broadcast %cst_28 : f32 to vector<16x128xf32>
    %55 = arith.mulf %42, %54 : vector<16x128xf32>
    %cst_29 = arith.constant 1.000000e+00 : f32
    %56 = vector.broadcast %cst_29 : f32 to vector<16x128xf32>
    %57 = arith.subf %56, %43 : vector<16x128xf32>
    %58 = arith.mulf %55, %57 : vector<16x128xf32>
    %59 = arith.index_cast %c1_i32 : i32 to index
    %c0_30 = arith.constant 0 : index
    %c0_31 = arith.constant 0 : index
    %60 = vector.load %arg9[%59, %c0_30, %c0_31] : memref<8x16x128xf32, #tpu.memory_space<vmem>>, vector<1x16x128xf32>
    %61 = vector.shape_cast %60 : vector<1x16x128xf32> to vector<16x128xf32>
    %62 = arith.addf %58, %61 : vector<16x128xf32>
    %cst_32 = arith.constant 1.000000e-01 : f32
    %63 = vector.broadcast %cst_32 : f32 to vector<16x128xf32>
    %64 = arith.mulf %53, %63 : vector<16x128xf32>
    %65 = arith.subf %62, %64 : vector<16x128xf32>
    %cst_33 = arith.constant 5.000000e-01 : f32
    %66 = vector.broadcast %cst_33 : f32 to vector<16x128xf32>
    %67 = arith.cmpf ogt, %65, %66 : vector<16x128xf32>
    %68 = arith.extui %67 : vector<16x128xi1> to vector<16x128xi32>
    %69 = arith.sitofp %68 : vector<16x128xi32> to vector<16x128xf32>
    %70 = arith.truncf %43 : vector<16x128xf32> to vector<16x128xbf16>
    %cst_34 = arith.constant dense<0.000000e+00> : vector<16x128xf32>
    %71 = tpu.matmul %70, %10, %cst_34 {dimension_numbers = #tpu.dot_dimension_numbers<[1], [0], [0], [1], [0, 0, 1, 1], [], []>} : vector<16x128xbf16>, vector<128x128xbf16>, vector<16x128xf32> -> vector<16x128xf32>
    %72 = vector.broadcast %11 : vector<1x128xf32> to vector<16x128xf32>
    %73 = arith.addf %71, %72 : vector<16x128xf32>
    %cst_35 = arith.constant 5.000000e-01 : f32
    %74 = vector.broadcast %cst_35 : f32 to vector<16x128xf32>
    %75 = arith.cmpf ogt, %73, %74 : vector<16x128xf32>
    %76 = arith.extui %75 : vector<16x128xi1> to vector<16x128xi32>
    %77 = arith.sitofp %76 : vector<16x128xi32> to vector<16x128xf32>
    %78 = arith.addf %65, %73 : vector<16x128xf32>
    %79 = arith.addf %69, %77 : vector<16x128xf32>
    %80 = arith.addf %44, %79 : vector<16x128xf32>
    %81 = arith.index_cast %c1_i32 : i32 to index
    %c0_36 = arith.constant 0 : index
    %c0_37 = arith.constant 0 : index
    %82 = vector.load %arg6[%81, %c0_36, %c0_37] : memref<8x16x128xf32, #tpu.memory_space<vmem>>, vector<1x16x128xf32>
    %83 = vector.shape_cast %82 : vector<1x16x128xf32> to vector<16x128xf32>
    %84 = vector.shape_cast %79 : vector<16x128xf32> to vector<1x16x128xf32>
    tpu.vector_store %arg6[%81, %c0_36, %c0_37], %84 {strides = array<i32>} : memref<8x16x128xf32, #tpu.memory_space<vmem>>, vector<1x16x128xf32>,
    %c2_i32 = arith.constant 2 : i32
    %cst_38 = arith.constant 0.899999976 : f32
    %85 = vector.broadcast %cst_38 : f32 to vector<16x128xf32>
    %86 = arith.mulf %85, %53 : vector<16x128xf32>
    %cst_39 = arith.constant 5.000000e-01 : f32
    %87 = vector.broadcast %cst_39 : f32 to vector<16x128xf32>
    %88 = arith.mulf %87, %79 : vector<16x128xf32>
    %89 = arith.addf %86, %88 : vector<16x128xf32>
    %cst_40 = arith.constant 2.000000e-01 : f32
    %90 = vector.broadcast %cst_40 : f32 to vector<16x128xf32>
    %91 = arith.mulf %78, %90 : vector<16x128xf32>
    %cst_41 = arith.constant 1.000000e+00 : f32
    %92 = vector.broadcast %cst_41 : f32 to vector<16x128xf32>
    %93 = arith.subf %92, %79 : vector<16x128xf32>
    %94 = arith.mulf %91, %93 : vector<16x128xf32>
    %95 = arith.index_cast %c2_i32 : i32 to index
    %c0_42 = arith.constant 0 : index
    %c0_43 = arith.constant 0 : index
    %96 = vector.load %arg9[%95, %c0_42, %c0_43] : memref<8x16x128xf32, #tpu.memory_space<vmem>>, vector<1x16x128xf32>
    %97 = vector.shape_cast %96 : vector<1x16x128xf32> to vector<16x128xf32>
    %98 = arith.addf %94, %97 : vector<16x128xf32>
    %cst_44 = arith.constant 1.000000e-01 : f32
    %99 = vector.broadcast %cst_44 : f32 to vector<16x128xf32>
    %100 = arith.mulf %89, %99 : vector<16x128xf32>
    %101 = arith.subf %98, %100 : vector<16x128xf32>
    %cst_45 = arith.constant 5.000000e-01 : f32
    %102 = vector.broadcast %cst_45 : f32 to vector<16x128xf32>
    %103 = arith.cmpf ogt, %101, %102 : vector<16x128xf32>
    %104 = arith.extui %103 : vector<16x128xi1> to vector<16x128xi32>
    %105 = arith.sitofp %104 : vector<16x128xi32> to vector<16x128xf32>
    %106 = arith.truncf %79 : vector<16x128xf32> to vector<16x128xbf16>
    %cst_46 = arith.constant dense<0.000000e+00> : vector<16x128xf32>
    %107 = tpu.matmul %106, %10, %cst_46 {dimension_numbers = #tpu.dot_dimension_numbers<[1], [0], [0], [1], [0, 0, 1, 1], [], []>} : vector<16x128xbf16>, vector<128x128xbf16>, vector<16x128xf32> -> vector<16x128xf32>
    %108 = vector.broadcast %11 : vector<1x128xf32> to vector<16x128xf32>
    %109 = arith.addf %107, %108 : vector<16x128xf32>
    %cst_47 = arith.constant 5.000000e-01 : f32
    %110 = vector.broadcast %cst_47 : f32 to vector<16x128xf32>
    %111 = arith.cmpf ogt, %109, %110 : vector<16x128xf32>
    %112 = arith.extui %111 : vector<16x128xi1> to vector<16x128xi32>
    %113 = arith.sitofp %112 : vector<16x128xi32> to vector<16x128xf32>
    %114 = arith.addf %101, %109 : vector<16x128xf32>
    %115 = arith.addf %105, %113 : vector<16x128xf32>
    %116 = arith.addf %80, %115 : vector<16x128xf32>
    %117 = arith.index_cast %c2_i32 : i32 to index
    %c0_48 = arith.constant 0 : index
    %c0_49 = arith.constant 0 : index
    %118 = vector.load %arg6[%117, %c0_48, %c0_49] : memref<8x16x128xf32, #tpu.memory_space<vmem>>, vector<1x16x128xf32>
    %119 = vector.shape_cast %118 : vector<1x16x128xf32> to vector<16x128xf32>
    %120 = vector.shape_cast %115 : vector<16x128xf32> to vector<1x16x128xf32>
    tpu.vector_store %arg6[%117, %c0_48, %c0_49], %120 {strides = array<i32>} : memref<8x16x128xf32, #tpu.memory_space<vmem>>, vector<1x16x128xf32>,
    %c3_i32 = arith.constant 3 : i32
    %cst_50 = arith.constant 0.899999976 : f32
    %121 = vector.broadcast %cst_50 : f32 to vector<16x128xf32>
    %122 = arith.mulf %121, %89 : vector<16x128xf32>
    %cst_51 = arith.constant 5.000000e-01 : f32
    %123 = vector.broadcast %cst_51 : f32 to vector<16x128xf32>
    %124 = arith.mulf %123, %115 : vector<16x128xf32>
    %125 = arith.addf %122, %124 : vector<16x128xf32>
    %cst_52 = arith.constant 2.000000e-01 : f32
    %126 = vector.broadcast %cst_52 : f32 to vector<16x128xf32>
    %127 = arith.mulf %114, %126 : vector<16x128xf32>
    %cst_53 = arith.constant 1.000000e+00 : f32
    %128 = vector.broadcast %cst_53 : f32 to vector<16x128xf32>
    %129 = arith.subf %128, %115 : vector<16x128xf32>
    %130 = arith.mulf %127, %129 : vector<16x128xf32>
    %131 = arith.index_cast %c3_i32 : i32 to index
    %c0_54 = arith.constant 0 : index
    %c0_55 = arith.constant 0 : index
    %132 = vector.load %arg9[%131, %c0_54, %c0_55] : memref<8x16x128xf32, #tpu.memory_space<vmem>>, vector<1x16x128xf32>
    %133 = vector.shape_cast %132 : vector<1x16x128xf32> to vector<16x128xf32>
    %134 = arith.addf %130, %133 : vector<16x128xf32>
    %cst_56 = arith.constant 1.000000e-01 : f32
    %135 = vector.broadcast %cst_56 : f32 to vector<16x128xf32>
    %136 = arith.mulf %125, %135 : vector<16x128xf32>
    %137 = arith.subf %134, %136 : vector<16x128xf32>
    %cst_57 = arith.constant 5.000000e-01 : f32
    %138 = vector.broadcast %cst_57 : f32 to vector<16x128xf32>
    %139 = arith.cmpf ogt, %137, %138 : vector<16x128xf32>
    %140 = arith.extui %139 : vector<16x128xi1> to vector<16x128xi32>
    %141 = arith.sitofp %140 : vector<16x128xi32> to vector<16x128xf32>
    %142 = arith.truncf %115 : vector<16x128xf32> to vector<16x128xbf16>
    %cst_58 = arith.constant dense<0.000000e+00> : vector<16x128xf32>
    %143 = tpu.matmul %142, %10, %cst_58 {dimension_numbers = #tpu.dot_dimension_numbers<[1], [0], [0], [1], [0, 0, 1, 1], [], []>} : vector<16x128xbf16>, vector<128x128xbf16>, vector<16x128xf32> -> vector<16x128xf32>
    %144 = vector.broadcast %11 : vector<1x128xf32> to vector<16x128xf32>
    %145 = arith.addf %143, %144 : vector<16x128xf32>
    %cst_59 = arith.constant 5.000000e-01 : f32
    %146 = vector.broadcast %cst_59 : f32 to vector<16x128xf32>
    %147 = arith.cmpf ogt, %145, %146 : vector<16x128xf32>
    %148 = arith.extui %147 : vector<16x128xi1> to vector<16x128xi32>
    %149 = arith.sitofp %148 : vector<16x128xi32> to vector<16x128xf32>
    %150 = arith.addf %137, %145 : vector<16x128xf32>
    %151 = arith.addf %141, %149 : vector<16x128xf32>
    %152 = arith.addf %116, %151 : vector<16x128xf32>
    %153 = arith.index_cast %c3_i32 : i32 to index
    %c0_60 = arith.constant 0 : index
    %c0_61 = arith.constant 0 : index
    %154 = vector.load %arg6[%153, %c0_60, %c0_61] : memref<8x16x128xf32, #tpu.memory_space<vmem>>, vector<1x16x128xf32>
    %155 = vector.shape_cast %154 : vector<1x16x128xf32> to vector<16x128xf32>
    %156 = vector.shape_cast %151 : vector<16x128xf32> to vector<1x16x128xf32>
    tpu.vector_store %arg6[%153, %c0_60, %c0_61], %156 {strides = array<i32>} : memref<8x16x128xf32, #tpu.memory_space<vmem>>, vector<1x16x128xf32>,
    %c4_i32 = arith.constant 4 : i32
    %cst_62 = arith.constant 0.899999976 : f32
    %157 = vector.broadcast %cst_62 : f32 to vector<16x128xf32>
    %158 = arith.mulf %157, %125 : vector<16x128xf32>
    %cst_63 = arith.constant 5.000000e-01 : f32
    %159 = vector.broadcast %cst_63 : f32 to vector<16x128xf32>
    %160 = arith.mulf %159, %151 : vector<16x128xf32>
    %161 = arith.addf %158, %160 : vector<16x128xf32>
    %cst_64 = arith.constant 2.000000e-01 : f32
    %162 = vector.broadcast %cst_64 : f32 to vector<16x128xf32>
    %163 = arith.mulf %150, %162 : vector<16x128xf32>
    %cst_65 = arith.constant 1.000000e+00 : f32
    %164 = vector.broadcast %cst_65 : f32 to vector<16x128xf32>
    %165 = arith.subf %164, %151 : vector<16x128xf32>
    %166 = arith.mulf %163, %165 : vector<16x128xf32>
    %167 = arith.index_cast %c4_i32 : i32 to index
    %c0_66 = arith.constant 0 : index
    %c0_67 = arith.constant 0 : index
    %168 = vector.load %arg9[%167, %c0_66, %c0_67] : memref<8x16x128xf32, #tpu.memory_space<vmem>>, vector<1x16x128xf32>
    %169 = vector.shape_cast %168 : vector<1x16x128xf32> to vector<16x128xf32>
    %170 = arith.addf %166, %169 : vector<16x128xf32>
    %cst_68 = arith.constant 1.000000e-01 : f32
    %171 = vector.broadcast %cst_68 : f32 to vector<16x128xf32>
    %172 = arith.mulf %161, %171 : vector<16x128xf32>
    %173 = arith.subf %170, %172 : vector<16x128xf32>
    %cst_69 = arith.constant 5.000000e-01 : f32
    %174 = vector.broadcast %cst_69 : f32 to vector<16x128xf32>
    %175 = arith.cmpf ogt, %173, %174 : vector<16x128xf32>
    %176 = arith.extui %175 : vector<16x128xi1> to vector<16x128xi32>
    %177 = arith.sitofp %176 : vector<16x128xi32> to vector<16x128xf32>
    %178 = arith.truncf %151 : vector<16x128xf32> to vector<16x128xbf16>
    %cst_70 = arith.constant dense<0.000000e+00> : vector<16x128xf32>
    %179 = tpu.matmul %178, %10, %cst_70 {dimension_numbers = #tpu.dot_dimension_numbers<[1], [0], [0], [1], [0, 0, 1, 1], [], []>} : vector<16x128xbf16>, vector<128x128xbf16>, vector<16x128xf32> -> vector<16x128xf32>
    %180 = vector.broadcast %11 : vector<1x128xf32> to vector<16x128xf32>
    %181 = arith.addf %179, %180 : vector<16x128xf32>
    %cst_71 = arith.constant 5.000000e-01 : f32
    %182 = vector.broadcast %cst_71 : f32 to vector<16x128xf32>
    %183 = arith.cmpf ogt, %181, %182 : vector<16x128xf32>
    %184 = arith.extui %183 : vector<16x128xi1> to vector<16x128xi32>
    %185 = arith.sitofp %184 : vector<16x128xi32> to vector<16x128xf32>
    %186 = arith.addf %173, %181 : vector<16x128xf32>
    %187 = arith.addf %177, %185 : vector<16x128xf32>
    %188 = arith.addf %152, %187 : vector<16x128xf32>
    %189 = arith.index_cast %c4_i32 : i32 to index
    %c0_72 = arith.constant 0 : index
    %c0_73 = arith.constant 0 : index
    %190 = vector.load %arg6[%189, %c0_72, %c0_73] : memref<8x16x128xf32, #tpu.memory_space<vmem>>, vector<1x16x128xf32>
    %191 = vector.shape_cast %190 : vector<1x16x128xf32> to vector<16x128xf32>
    %192 = vector.shape_cast %187 : vector<16x128xf32> to vector<1x16x128xf32>
    tpu.vector_store %arg6[%189, %c0_72, %c0_73], %192 {strides = array<i32>} : memref<8x16x128xf32, #tpu.memory_space<vmem>>, vector<1x16x128xf32>,
    %c5_i32 = arith.constant 5 : i32
    %cst_74 = arith.constant 0.899999976 : f32
    %193 = vector.broadcast %cst_74 : f32 to vector<16x128xf32>
    %194 = arith.mulf %193, %161 : vector<16x128xf32>
    %cst_75 = arith.constant 5.000000e-01 : f32
    %195 = vector.broadcast %cst_75 : f32 to vector<16x128xf32>
    %196 = arith.mulf %195, %187 : vector<16x128xf32>
    %197 = arith.addf %194, %196 : vector<16x128xf32>
    %cst_76 = arith.constant 2.000000e-01 : f32
    %198 = vector.broadcast %cst_76 : f32 to vector<16x128xf32>
    %199 = arith.mulf %186, %198 : vector<16x128xf32>
    %cst_77 = arith.constant 1.000000e+00 : f32
    %200 = vector.broadcast %cst_77 : f32 to vector<16x128xf32>
    %201 = arith.subf %200, %187 : vector<16x128xf32>
    %202 = arith.mulf %199, %201 : vector<16x128xf32>
    %203 = arith.index_cast %c5_i32 : i32 to index
    %c0_78 = arith.constant 0 : index
    %c0_79 = arith.constant 0 : index
    %204 = vector.load %arg9[%203, %c0_78, %c0_79] : memref<8x16x128xf32, #tpu.memory_space<vmem>>, vector<1x16x128xf32>
    %205 = vector.shape_cast %204 : vector<1x16x128xf32> to vector<16x128xf32>
    %206 = arith.addf %202, %205 : vector<16x128xf32>
    %cst_80 = arith.constant 1.000000e-01 : f32
    %207 = vector.broadcast %cst_80 : f32 to vector<16x128xf32>
    %208 = arith.mulf %197, %207 : vector<16x128xf32>
    %209 = arith.subf %206, %208 : vector<16x128xf32>
    %cst_81 = arith.constant 5.000000e-01 : f32
    %210 = vector.broadcast %cst_81 : f32 to vector<16x128xf32>
    %211 = arith.cmpf ogt, %209, %210 : vector<16x128xf32>
    %212 = arith.extui %211 : vector<16x128xi1> to vector<16x128xi32>
    %213 = arith.sitofp %212 : vector<16x128xi32> to vector<16x128xf32>
    %214 = arith.truncf %187 : vector<16x128xf32> to vector<16x128xbf16>
    %cst_82 = arith.constant dense<0.000000e+00> : vector<16x128xf32>
    %215 = tpu.matmul %214, %10, %cst_82 {dimension_numbers = #tpu.dot_dimension_numbers<[1], [0], [0], [1], [0, 0, 1, 1], [], []>} : vector<16x128xbf16>, vector<128x128xbf16>, vector<16x128xf32> -> vector<16x128xf32>
    %216 = vector.broadcast %11 : vector<1x128xf32> to vector<16x128xf32>
    %217 = arith.addf %215, %216 : vector<16x128xf32>
    %cst_83 = arith.constant 5.000000e-01 : f32
    %218 = vector.broadcast %cst_83 : f32 to vector<16x128xf32>
    %219 = arith.cmpf ogt, %217, %218 : vector<16x128xf32>
    %220 = arith.extui %219 : vector<16x128xi1> to vector<16x128xi32>
    %221 = arith.sitofp %220 : vector<16x128xi32> to vector<16x128xf32>
    %222 = arith.addf %209, %217 : vector<16x128xf32>
    %223 = arith.addf %213, %221 : vector<16x128xf32>
    %224 = arith.addf %188, %223 : vector<16x128xf32>
    %225 = arith.index_cast %c5_i32 : i32 to index
    %c0_84 = arith.constant 0 : index
    %c0_85 = arith.constant 0 : index
    %226 = vector.load %arg6[%225, %c0_84, %c0_85] : memref<8x16x128xf32, #tpu.memory_space<vmem>>, vector<1x16x128xf32>
    %227 = vector.shape_cast %226 : vector<1x16x128xf32> to vector<16x128xf32>
    %228 = vector.shape_cast %223 : vector<16x128xf32> to vector<1x16x128xf32>
    tpu.vector_store %arg6[%225, %c0_84, %c0_85], %228 {strides = array<i32>} : memref<8x16x128xf32, #tpu.memory_space<vmem>>, vector<1x16x128xf32>,
    %c6_i32 = arith.constant 6 : i32
    %cst_86 = arith.constant 0.899999976 : f32
    %229 = vector.broadcast %cst_86 : f32 to vector<16x128xf32>
    %230 = arith.mulf %229, %197 : vector<16x128xf32>
    %cst_87 = arith.constant 5.000000e-01 : f32
    %231 = vector.broadcast %cst_87 : f32 to vector<16x128xf32>
    %232 = arith.mulf %231, %223 : vector<16x128xf32>
    %233 = arith.addf %230, %232 : vector<16x128xf32>
    %cst_88 = arith.constant 2.000000e-01 : f32
    %234 = vector.broadcast %cst_88 : f32 to vector<16x128xf32>
    %235 = arith.mulf %222, %234 : vector<16x128xf32>
    %cst_89 = arith.constant 1.000000e+00 : f32
    %236 = vector.broadcast %cst_89 : f32 to vector<16x128xf32>
    %237 = arith.subf %236, %223 : vector<16x128xf32>
    %238 = arith.mulf %235, %237 : vector<16x128xf32>
    %239 = arith.index_cast %c6_i32 : i32 to index
    %c0_90 = arith.constant 0 : index
    %c0_91 = arith.constant 0 : index
    %240 = vector.load %arg9[%239, %c0_90, %c0_91] : memref<8x16x128xf32, #tpu.memory_space<vmem>>, vector<1x16x128xf32>
    %241 = vector.shape_cast %240 : vector<1x16x128xf32> to vector<16x128xf32>
    %242 = arith.addf %238, %241 : vector<16x128xf32>
    %cst_92 = arith.constant 1.000000e-01 : f32
    %243 = vector.broadcast %cst_92 : f32 to vector<16x128xf32>
    %244 = arith.mulf %233, %243 : vector<16x128xf32>
    %245 = arith.subf %242, %244 : vector<16x128xf32>
    %cst_93 = arith.constant 5.000000e-01 : f32
    %246 = vector.broadcast %cst_93 : f32 to vector<16x128xf32>
    %247 = arith.cmpf ogt, %245, %246 : vector<16x128xf32>
    %248 = arith.extui %247 : vector<16x128xi1> to vector<16x128xi32>
    %249 = arith.sitofp %248 : vector<16x128xi32> to vector<16x128xf32>
    %250 = arith.truncf %223 : vector<16x128xf32> to vector<16x128xbf16>
    %cst_94 = arith.constant dense<0.000000e+00> : vector<16x128xf32>
    %251 = tpu.matmul %250, %10, %cst_94 {dimension_numbers = #tpu.dot_dimension_numbers<[1], [0], [0], [1], [0, 0, 1, 1], [], []>} : vector<16x128xbf16>, vector<128x128xbf16>, vector<16x128xf32> -> vector<16x128xf32>
    %252 = vector.broadcast %11 : vector<1x128xf32> to vector<16x128xf32>
    %253 = arith.addf %251, %252 : vector<16x128xf32>
    %cst_95 = arith.constant 5.000000e-01 : f32
    %254 = vector.broadcast %cst_95 : f32 to vector<16x128xf32>
    %255 = arith.cmpf ogt, %253, %254 : vector<16x128xf32>
    %256 = arith.extui %255 : vector<16x128xi1> to vector<16x128xi32>
    %257 = arith.sitofp %256 : vector<16x128xi32> to vector<16x128xf32>
    %258 = arith.addf %245, %253 : vector<16x128xf32>
    %259 = arith.addf %249, %257 : vector<16x128xf32>
    %260 = arith.addf %224, %259 : vector<16x128xf32>
    %261 = arith.index_cast %c6_i32 : i32 to index
    %c0_96 = arith.constant 0 : index
    %c0_97 = arith.constant 0 : index
    %262 = vector.load %arg6[%261, %c0_96, %c0_97] : memref<8x16x128xf32, #tpu.memory_space<vmem>>, vector<1x16x128xf32>
    %263 = vector.shape_cast %262 : vector<1x16x128xf32> to vector<16x128xf32>
    %264 = vector.shape_cast %259 : vector<16x128xf32> to vector<1x16x128xf32>
    tpu.vector_store %arg6[%261, %c0_96, %c0_97], %264 {strides = array<i32>} : memref<8x16x128xf32, #tpu.memory_space<vmem>>, vector<1x16x128xf32>,
    %c7_i32 = arith.constant 7 : i32
    %cst_98 = arith.constant 0.899999976 : f32
    %265 = vector.broadcast %cst_98 : f32 to vector<16x128xf32>
    %266 = arith.mulf %265, %233 : vector<16x128xf32>
    %cst_99 = arith.constant 5.000000e-01 : f32
    %267 = vector.broadcast %cst_99 : f32 to vector<16x128xf32>
    %268 = arith.mulf %267, %259 : vector<16x128xf32>
    %269 = arith.addf %266, %268 : vector<16x128xf32>
    %cst_100 = arith.constant 2.000000e-01 : f32
    %270 = vector.broadcast %cst_100 : f32 to vector<16x128xf32>
    %271 = arith.mulf %258, %270 : vector<16x128xf32>
    %cst_101 = arith.constant 1.000000e+00 : f32
    %272 = vector.broadcast %cst_101 : f32 to vector<16x128xf32>
    %273 = arith.subf %272, %259 : vector<16x128xf32>
    %274 = arith.mulf %271, %273 : vector<16x128xf32>
    %275 = arith.index_cast %c7_i32 : i32 to index
    %c0_102 = arith.constant 0 : index
    %c0_103 = arith.constant 0 : index
    %276 = vector.load %arg9[%275, %c0_102, %c0_103] : memref<8x16x128xf32, #tpu.memory_space<vmem>>, vector<1x16x128xf32>
    %277 = vector.shape_cast %276 : vector<1x16x128xf32> to vector<16x128xf32>
    %278 = arith.addf %274, %277 : vector<16x128xf32>
    %cst_104 = arith.constant 1.000000e-01 : f32
    %279 = vector.broadcast %cst_104 : f32 to vector<16x128xf32>
    %280 = arith.mulf %269, %279 : vector<16x128xf32>
    %281 = arith.subf %278, %280 : vector<16x128xf32>
    %cst_105 = arith.constant 5.000000e-01 : f32
    %282 = vector.broadcast %cst_105 : f32 to vector<16x128xf32>
    %283 = arith.cmpf ogt, %281, %282 : vector<16x128xf32>
    %284 = arith.extui %283 : vector<16x128xi1> to vector<16x128xi32>
    %285 = arith.sitofp %284 : vector<16x128xi32> to vector<16x128xf32>
    %286 = arith.truncf %259 : vector<16x128xf32> to vector<16x128xbf16>
    %cst_106 = arith.constant dense<0.000000e+00> : vector<16x128xf32>
    %287 = tpu.matmul %286, %10, %cst_106 {dimension_numbers = #tpu.dot_dimension_numbers<[1], [0], [0], [1], [0, 0, 1, 1], [], []>} : vector<16x128xbf16>, vector<128x128xbf16>, vector<16x128xf32> -> vector<16x128xf32>
    %288 = vector.broadcast %11 : vector<1x128xf32> to vector<16x128xf32>
    %289 = arith.addf %287, %288 : vector<16x128xf32>
    %cst_107 = arith.constant 5.000000e-01 : f32
    %290 = vector.broadcast %cst_107 : f32 to vector<16x128xf32>
    %291 = arith.cmpf ogt, %289, %290 : vector<16x128xf32>
    %292 = arith.extui %291 : vector<16x128xi1> to vector<16x128xi32>
    %293 = arith.sitofp %292 : vector<16x128xi32> to vector<16x128xf32>
    %294 = arith.addf %281, %289 : vector<16x128xf32>
    %295 = arith.addf %285, %293 : vector<16x128xf32>
    %296 = arith.addf %260, %295 : vector<16x128xf32>
    %297 = arith.index_cast %c7_i32 : i32 to index
    %c0_108 = arith.constant 0 : index
    %c0_109 = arith.constant 0 : index
    %298 = vector.load %arg6[%297, %c0_108, %c0_109] : memref<8x16x128xf32, #tpu.memory_space<vmem>>, vector<1x16x128xf32>
    %299 = vector.shape_cast %298 : vector<1x16x128xf32> to vector<16x128xf32>
    %300 = vector.shape_cast %295 : vector<16x128xf32> to vector<1x16x128xf32>
    tpu.vector_store %arg6[%297, %c0_108, %c0_109], %300 {strides = array<i32>} : memref<8x16x128xf32, #tpu.memory_space<vmem>>, vector<1x16x128xf32>,
    %c8_i32 = arith.constant 8 : i32
    %c0_110 = arith.constant 0 : index
    %c0_111 = arith.constant 0 : index
    %301 = vector.load %arg7[%c0_110, %c0_111] : memref<16x128xf32, #tpu.memory_space<vmem>>, vector<16x128xf32>
    tpu.vector_store %arg7[%c0_110, %c0_111], %294 {strides = array<i32>} : memref<16x128xf32, #tpu.memory_space<vmem>>, vector<16x128xf32>,
    %c0_112 = arith.constant 0 : index
    %c0_113 = arith.constant 0 : index
    %302 = vector.load %arg8[%c0_112, %c0_113] : memref<16x128xf32, #tpu.memory_space<vmem>>, vector<16x128xf32>
    tpu.vector_store %arg8[%c0_112, %c0_113], %296 {strides = array<i32>} : memref<16x128xf32, #tpu.memory_space<vmem>>, vector<16x128xf32>,
    return
  }
  func.func @transform_0(%arg0: i32) -> (i32, i32, i32) {
    %c0_i32 = arith.constant 0 : i32
    %c0_i32_0 = arith.constant 0 : i32
    %c0_i32_1 = arith.constant 0 : i32
    return %c0_i32, %arg0, %c0_i32_0 : i32, i32, i32
  }
  func.func @transform_1(%arg0: i32) -> (i32, i32) {
    %c0_i32 = arith.constant 0 : i32
    %c0_i32_0 = arith.constant 0 : i32
    %c0_i32_1 = arith.constant 0 : i32
    return %c0_i32, %c0_i32_0 : i32, i32
  }
  func.func @transform_2(%arg0: i32) -> (i32, i32) {
    %c0_i32 = arith.constant 0 : i32
    %c0_i32_0 = arith.constant 0 : i32
    %c0_i32_1 = arith.constant 0 : i32
    return %c0_i32, %c0_i32_0 : i32, i32
  }
  func.func @transform_3(%arg0: i32) -> (i32, i32) {
    %c0_i32 = arith.constant 0 : i32
    %c0_i32_0 = arith.constant 0 : i32
    %c0_i32_1 = arith.constant 0 : i32
    return %c0_i32, %c0_i32_0 : i32, i32
  }
  func.func @transform_4(%arg0: i32) -> (i32, i32) {
    %c0_i32 = arith.constant 0 : i32
    %c0_i32_0 = arith.constant 0 : i32
    %c0_i32_1 = arith.constant 0 : i32
    return %c0_i32, %c0_i32_0 : i32, i32
  }
  func.func @transform_5(%arg0: i32) -> (i32, i32, i32) {
    %c0_i32 = arith.constant 0 : i32
    %c0_i32_0 = arith.constant 0 : i32
    %c0_i32_1 = arith.constant 0 : i32
    return %c0_i32, %arg0, %c0_i32_0 : i32, i32, i32
  }
  func.func @transform_6(%arg0: i32) -> (i32, i32) {
    %c0_i32 = arith.constant 0 : i32
    %c0_i32_0 = arith.constant 0 : i32
    return %arg0, %c0_i32 : i32, i32
  }
  func.func @transform_7(%arg0: i32) -> (i32, i32) {
    %c0_i32 = arith.constant 0 : i32
    %c0_i32_0 = arith.constant 0 : i32
    return %arg0, %c0_i32 : i32, i32
  }
}

</mosaic_0001>

<bundles_post_ra>
// kernel: tpu_custom_call.1
= control target key start
LH: loop header
LB: loop body
LE: loop exit
PB: predicated region body
PF: predicated region fallthrough
CT: control target
= control target key end

     0   :  { %13 = vsyncpa [#allocation4], 0  ;;  %s1905_s0 = inlined_call_operand.hbm [shape: f32[8,16,128], index: 0, kind: input, shape index: {}]   ;;  %s1906_s1 = inlined_call_operand.hbm [shape: bf16[128,128], index: 1, kind: input, shape index: {}]   ;;  %s1907_s2 = inlined_call_operand.vmem [shape: f32[1,128], index: 2, kind: input, shape index: {}]   ;;  %s1908_s3 = inlined_call_operand.hbm [shape: bf16[128,128], index: 3, kind: input, shape index: {}]   ;;  %s1909_s4 = inlined_call_operand.vmem [shape: f32[1,128], index: 4, kind: input, shape index: {}]   ;;  %s1910_s5 = inlined_call_operand.hbm [shape: f32[8,16,128], index: 5, kind: output, shape index: {0}]   ;;  %s1911_s6 = inlined_call_operand.hbm [shape: f32[16,128], index: 6, kind: output, shape index: {1}]   ;;  %s1912_s7 = inlined_call_operand.hbm [shape: f32[16,128], index: 7, kind: output, shape index: {2}]  }
   0x1   :  { %14 = vsyncpa [#allocation7], 0 }
   0x2   :  { %15 = vsyncpa [#allocation5], 0 }
   0x3   :  { %16 = vsyncpa [#allocation11], 0  ;;  %s1537_s24 = smov [#allocation6]  }
   0x4   :  { %s34_s25 = sshll.u32 %s1537_s24, 4  ;;  %s35_s25 = int_to_ptr.vmem [resolvable:$true] %s34_s25 }
   0x5   :  { %s1417_s26 = scalar_lea.vmem %s35_s25, 1024  ;;  %p1422_p1 = scmp.lt.s32.totalorder %s35_s25, %s35_s25 }
   0x6   :  { %p1418_p0 = scmp.ne.s32.totalorder %s35_s25, %s1417_s26  ;;  %p1423_p2 = scmp.lt.s32.totalorder %s1417_s26, %s1417_s26 }
   0x8   :  { %p1424_p3 = por %p1423_p2, %p1422_p1 }
   0xa   :  { %p1425_p4 = pnand %p1424_p3, %p1418_p0 }
   0xc   :  { %1428 = shalt.err (!%p1425_p4)
}
   0xd   :  { %s1538_s27 = smov 64   ;;  %s1539_s28 = smov 4  }
   0xe   :  { %40 = dma.hbm_to_vmem [thread:$0]  %s1906_s1, 1024, %s35_s25, [#allocation7], %s1538_s27, %s1538_s27, %s1539_s28  }
   0xf   :  { %s1540_s8 = smov [#allocation3]  }
  0x10   :  { %s22_s9 = sshll.u32 %s1540_s8, 4  ;;  %s23_s9 = int_to_ptr.vmem [resolvable:$true] %s22_s9 }
  0x11   :  { %s1437_s10 = scalar_lea.vmem %s23_s9, 2048  ;;  %p1442_p6 = scmp.lt.s32.totalorder %s23_s9, %s23_s9 }
  0x12   :  { %p1438_p5 = scmp.ne.s32.totalorder %s23_s9, %s1437_s10  ;;  %p1443_p7 = scmp.lt.s32.totalorder %s1437_s10, %s1437_s10 }
  0x14   :  { %p1444_p8 = por %p1443_p7, %p1442_p6 }
  0x16   :  { %p1445_p9 = pnand %p1444_p8, %p1438_p5 }
  0x18   :  { %1448 = shalt.err (!%p1445_p9)
}
  0x19   :  { %s1541_s11 = smov 128   ;;  %s1542_s12 = smov 8  }
  0x1a   :  { %28 = dma.hbm_to_vmem [thread:$0]  %s1905_s0, 2048, %s23_s9, [#allocation4], %s1541_s11, %s1541_s11, %s1542_s12  }
  0x1b   :  { %s1543_s1 = smov [#allocation8]  }
  0x1c   :  { %s48_s15 = sshll.u32 %s1543_s1, 4  ;;  %s49_s15 = int_to_ptr.vmem [resolvable:$true] %s48_s15 }
  0x1d   :  { %s1457_s16 = scalar_lea.vmem %s49_s15, 1024  ;;  %p1462_p11 = scmp.lt.s32.totalorder %s49_s15, %s49_s15 }
  0x1e   :  { %p1458_p10 = scmp.ne.s32.totalorder %s49_s15, %s1457_s16  ;;  %p1463_p12 = scmp.lt.s32.totalorder %s1457_s16, %s1457_s16 }
  0x20   :  { %p1464_p13 = por %p1463_p12, %p1462_p11 }
  0x22   :  { %p1465_p0 = pnand %p1464_p13, %p1458_p10 }
  0x24   :  { %1468 = shalt.err (!%p1465_p0)
}
  0x25   :  { %54 = dma.hbm_to_vmem [thread:$0]  %s1908_s3, 1024, %s49_s15, [#allocation7], %s1538_s27, %s1538_s27, %s1539_s28  }
  0x26   :  { %1529 = dma.done.wait [#allocation4], 2048  }
  0x27   :  { %1530 = vsyncadd [#allocation4], 4294965248 }
  0x28   :  { %1531 = dma.done.wait [#allocation7], 2048  }
  0x29   :  { %1532 = vsyncadd [#allocation7], 4294965248  ;;  %v1544_v0 = vmov 0.0   ;;  %vm1545_vm0 = vmmov 0   ;;  %v1393_v1 = vld [vmem:[#allocation6 + $0x38] sm:$0xff]   ;;  %v1395_v3 = vld [vmem:[#allocation6 + $0x30] sm:$0xff]  }
  0x2a   :  { %1220 = vmatprep.subr.bf16.mxu1 %v1544_v0  ;;  %1236 = vmatprep.mubr.msk.bf16.mxu1 %vm1545_vm0, %v1544_v0  ;;  %v1605_v2 = vld [vmem:[#allocation8 + $0x38] sm:$0xff]   ;;  %v1608_v4 = vld [vmem:[#allocation8 + $0x30] sm:$0xff]   ;;  %v1397_v5 = vld [vmem:[#allocation6 + $0x28] sm:$0xff]   ;;  %v1546_v26 = vmov 0   ;;  %s1548_s21 = smov [#allocation9]   ;;  %s1549_s23 = smov [#allocation12]  }
  0x2b   :  { %1188 = vmatprep.subr.bf16.mxu0 %v1393_v1  ;;  %1221 = vmatpush3.bf16.msra.mxu1 %v1605_v2  ;;  %v1612_v6 = vld [vmem:[#allocation8 + $0x28] sm:$0xff]   ;;  %v1399_v7 = vld [vmem:[#allocation6 + $0x20] sm:$0xff]   ;;  %v1401_v9 = vld [vmem:[#allocation6 + $0x18] sm:$0xff]   ;;  %s1006_s22 = sshll.u32 %s1548_s21, 4  ;;  %s1030_s24 = sshll.u32 %s1549_s23, 4  ;;  %s1007_s22 = int_to_ptr.vmem [resolvable:$true] %s1006_s22  ;;  %s1031_s24 = int_to_ptr.vmem [resolvable:$true] %s1030_s24 }
  0x2c   :  { %1189 = vmatpush3.bf16.msra.mxu0 %v1393_v1  ;;  %1222 = vmatprep.subr.bf16.mxu1 %v1544_v0  ;;  %v1616_v8 = vld [vmem:[#allocation8 + $0x20] sm:$0xff]   ;;  %v1620_v10 = vld [vmem:[#allocation8 + $0x18] sm:$0xff]   ;;  %v1403_v11 = vld [vmem:[#allocation6 + $0x10] sm:$0xff]  }
  0x2d   :  { %1190 = vmatprep.subr.bf16.mxu0 %v1395_v3  ;;  %v67_v12 = vld [vmem:[#allocation3] sm:$0xff]  ;;  %v68_v13 = vld [vmem:[#allocation3 + $0x8] sm:$0xff]  ;;  %v1624_v15 = vld [vmem:[#allocation8 + $0x10] sm:$0xff]  }
  0x2e   :  { %v83_v14 = vpack.c.bf16 %v68_v13, %v67_v12  ;;  %v1405_v16 = vld [vmem:[#allocation6 + $0x8] sm:$0xff]   ;;  %v1407_v18 = vld [vmem:[#allocation6] sm:$0xff]   ;;  %v69_v20 = vld [vmem:[#allocation3 + $0x10] sm:$0xff] }
  0x2f   :  { %1223 = vmatpush3.bf16.msra.mxu1 %v1608_v4  ;;  %v1628_v17 = vld [vmem:[#allocation8 + $0x8] sm:$0xff]   ;;  %v1632_v19 = vld [vmem:[#allocation8] sm:$0xff]   ;;  %v70_v21 = vld [vmem:[#allocation3 + $0x18] sm:$0xff] }
  0x30   :  { %1191 = vmatpush3.bf16.msra.mxu0 %v1395_v3  ;;  %1224 = vmatprep.subr.bf16.mxu1 %v1544_v0  ;;  %v71_v22 = vld [vmem:[#allocation3 + $0x20] sm:$0xff]  ;;  %v72_v23 = vld [vmem:[#allocation3 + $0x28] sm:$0xff]  ;;  %v84_v24 = vpack.c.bf16 %v70_v21, %v69_v20  ;;  %v73_v27 = vld [vmem:[#allocation3 + $0x30] sm:$0xff] }
  0x31   :  { %1192 = vmatprep.subr.bf16.mxu0 %v1397_v5  ;;  %1204 = vmatprep.mubr.bf16.mxu0 %v83_v14  ;;  %v85_v25 = vpack.c.bf16 %v72_v23, %v71_v22  ;;  %v74_v28 = vld [vmem:[#allocation3 + $0x38] sm:$0xff]  ;;  %v75_v29 = vld [vmem:[#allocation3 + $0x40] sm:$0xff]  ;;  %v76_v30 = vld [vmem:[#allocation3 + $0x48] sm:$0xff] }
  0x32   :  { %v86_v31 = vpack.c.bf16 %v74_v28, %v73_v27  ;;  %v87_v32 = vpack.c.bf16 %v76_v30, %v75_v29  ;;  %v77_v33 = vld [vmem:[#allocation3 + $0x50] sm:$0xff]  ;;  %v78_v34 = vld [vmem:[#allocation3 + $0x58] sm:$0xff]  ;;  %v79_v36 = vld [vmem:[#allocation3 + $0x60] sm:$0xff] }
  0x33   :  { %1225 = vmatpush3.bf16.msra.mxu1 %v1612_v6  ;;  %v88_v35 = vpack.c.bf16 %v78_v34, %v77_v33  ;;  %v80_v37 = vld [vmem:[#allocation3 + $0x68] sm:$0xff]  ;;  %v81_v39 = vld [vmem:[#allocation3 + $0x70] sm:$0xff]  ;;  %v82_v40 = vld [vmem:[#allocation3 + $0x78] sm:$0xff] }
  0x34   :  { %1193 = vmatpush3.bf16.msra.mxu0 %v1397_v5  ;;  %1226 = vmatprep.subr.bf16.mxu1 %v1544_v0  ;;  %v89_v38 = vpack.c.bf16 %v80_v37, %v79_v36  ;;  %v90_v41 = vpack.c.bf16 %v82_v40, %v81_v39  ;;  %v1677_v42 = vld [vmem:[%s1909_s4] ss:$0 sm:$0xff] }
  0x35   :  { %1194 = vmatprep.subr.bf16.mxu0 %v1399_v7  ;;  %v1683_v46 = vld [vmem:[%s1907_s2] ss:$0 sm:$0xff]  ;;  %s1547_s2 = smov [#allocation10]  }
  0x36   :  { %s1018_s4 = sshll.u32 %s1547_s2, 4  ;;  %s1019_s4 = int_to_ptr.vmem [resolvable:$true] %s1018_s4 }
  0x37   :  { %1227 = vmatpush3.bf16.msra.mxu1 %v1616_v8  ;;  %s1469_s25 = scalar_lea.vmem %s1019_s4, 256  ;;  %p1474_p2 = scmp.lt.s32.totalorder %s1019_s4, %s1019_s4 }
  0x38   :  { %1195 = vmatpush3.bf16.msra.mxu0 %v1399_v7  ;;  %1228 = vmatprep.subr.bf16.mxu1 %v1544_v0  ;;  %p1470_p1 = scmp.ne.s32.totalorder %s1019_s4, %s1469_s25  ;;  %p1475_p3 = scmp.lt.s32.totalorder %s1469_s25, %s1469_s25 }
  0x39   :  { %1196 = vmatprep.subr.bf16.mxu0 %v1401_v9 }
  0x3a   :  { %p1476_p4 = por %p1475_p3, %p1474_p2 }
  0x3b   :  { %1229 = vmatpush3.bf16.msra.mxu1 %v1620_v10 }
  0x3c   :  { %1197 = vmatpush3.bf16.msra.mxu0 %v1401_v9  ;;  %1230 = vmatprep.subr.bf16.mxu1 %v1544_v0  ;;  %p1477_p5 = pnand %p1476_p4, %p1470_p1 }
  0x3d   :  { %1198 = vmatprep.subr.bf16.mxu0 %v1403_v11 }
  0x3f   :  { %1231 = vmatpush3.bf16.msra.mxu1 %v1624_v15 }
  0x40   :  { %1199 = vmatpush3.bf16.msra.mxu0 %v1403_v11  ;;  %1232 = vmatprep.subr.bf16.mxu1 %v1544_v0 }
  0x41   :  { %1200 = vmatprep.subr.bf16.mxu0 %v1405_v16 }
  0x43   :  { %1233 = vmatpush3.bf16.msra.mxu1 %v1628_v17 }
  0x44   :  { %1201 = vmatpush3.bf16.msra.mxu0 %v1405_v16  ;;  %1234 = vmatprep.subr.bf16.mxu1 %v1544_v0 }
  0x45   :  { %1202 = vmatprep.subr.bf16.mxu0 %v1407_v18 }
  0x47   :  { %1235 = vmatpush3.bf16.msra.mxu1 %v1632_v19 }
  0x48   :  { %1203 = vmatpush3.bf16.msra.mxu0 %v1407_v18  ;;  %1260 = vmatprep.subr.bf16.mxu1 %v1544_v0 }
  0x49   :  { %1240 = vmatprep.subr.bf16.mxu0 %v1544_v0 }
  0x4a   :  { %1237 = vmatmul.mubr.bf16.vlgmr.msra.gmra.mxu1 %v1546_v26 }
  0x4b   :  { %1205 = vmatmul.mubr.bf16.vlgmr.msra.gmra.mxu0 %v84_v24  ;;  %1261 = vmatpush3.bf16.msra.mxu1 %v1605_v2 }
  0x4c   :  { %1241 = vmatpush3.bf16.msra.mxu0 %v1605_v2  ;;  %1208 = vmatprep.mubr.bf16.mxu0 %v85_v25 }
  0x4d   :  { %1242 = vmatprep.subr.bf16.mxu0 %v1544_v0  ;;  %1262 = vmatprep.subr.bf16.mxu1 %v1544_v0 }
  0x4e   :  { %1276 = vmatprep.mubr.msk.bf16.mxu1 %vm1545_vm0, %v1544_v0 }
  0x4f   :  { %1263 = vmatpush3.bf16.msra.mxu1 %v1608_v4 }
  0x50   :  { %1243 = vmatpush3.bf16.msra.mxu0 %v1608_v4  ;;  %1264 = vmatprep.subr.bf16.mxu1 %v1544_v0 }
  0x51   :  { %1244 = vmatprep.subr.bf16.mxu0 %v1544_v0 }
  0x53   :  { %1209 = vmatmul.mubr.bf16.gmra.mxu0 %v86_v31  ;;  %1265 = vmatpush3.bf16.msra.mxu1 %v1612_v6 }
  0x54   :  { %1245 = vmatpush3.bf16.msra.mxu0 %v1612_v6  ;;  %1212 = vmatprep.mubr.bf16.mxu0 %v87_v32 }
  0x55   :  { %1246 = vmatprep.subr.bf16.mxu0 %v1544_v0  ;;  %1266 = vmatprep.subr.bf16.mxu1 %v1544_v0 }
  0x57   :  { %1267 = vmatpush3.bf16.msra.mxu1 %v1616_v8 }
  0x58   :  { %1247 = vmatpush3.bf16.msra.mxu0 %v1616_v8  ;;  %1268 = vmatprep.subr.bf16.mxu1 %v1544_v0 }
  0x59   :  { %1248 = vmatprep.subr.bf16.mxu0 %v1544_v0 }
  0x5b   :  { %1213 = vmatmul.mubr.bf16.gmra.mxu0 %v88_v35  ;;  %1269 = vmatpush3.bf16.msra.mxu1 %v1620_v10 }
  0x5c   :  { %1249 = vmatpush3.bf16.msra.mxu0 %v1620_v10  ;;  %1270 = vmatprep.subr.bf16.mxu1 %v1544_v0 }
  0x5d   :  { %1250 = vmatprep.subr.bf16.mxu0 %v1544_v0  ;;  %1216 = vmatprep.mubr.bf16.mxu0 %v89_v38 }
  0x5f   :  { %1271 = vmatpush3.bf16.msra.mxu1 %v1624_v15 }
  0x60   :  { %1251 = vmatpush3.bf16.msra.mxu0 %v1624_v15  ;;  %1272 = vmatprep.subr.bf16.mxu1 %v1544_v0 }
  0x61   :  { %1252 = vmatprep.subr.bf16.mxu0 %v1544_v0 }
  0x63   :  { %1273 = vmatpush3.bf16.msra.mxu1 %v1628_v17  ;;  %1217 = vmatmul.mubr.bf16.gmra.mxu0 %v90_v41 }
  0x64   :  { %1253 = vmatpush3.bf16.msra.mxu0 %v1628_v17  ;;  %1274 = vmatprep.subr.bf16.mxu1 %v1544_v0 }
  0x65   :  { %1254 = vmatprep.subr.bf16.mxu0 %v1544_v0  ;;  %1256 = vmatprep.mubr.msk.bf16.mxu0 %vm1545_vm0, %v1544_v0 }
  0x67   :  { %1275 = vmatpush3.bf16.msra.mxu1 %v1632_v19 }
  0x68   :  { %1255 = vmatpush3.bf16.msra.mxu0 %v1632_v19  ;;  %1300 = vmatprep.subr.bf16.mxu1 %v1544_v0 }
  0x69   :  { %1280 = vmatprep.subr.bf16.mxu0 %v1544_v0 }
 0x10a   :  { %v390_v43 = vpop.f32.mrf.mxu1 }
 0x10b   :  { %v1206_v44 = vpop.f32.mrf.mxu0  ;;  %v391_v45 = vadd.f32 %v1677_v42, %v390_v43 }
 0x10c   :  { %v1238_v47 = vpop.f32.mrf.mxu1  ;;  %v205_v3 = vadd.f32 %v1206_v44, %v1683_v46 }
 0x10d   :  { %v196_v48 = vpop.f32.mrf.mxu0  ;;  %vm397_vm1 = vcmp.gt.f32.partialorder %v391_v45, 0.5 }
 0x10e   :  { %v197_v49 = vadd.f32 %v1683_v46, %v196_v48  ;;  %v1070_v50 = vsel %vm397_vm1, 1.0, %v1544_v0  ;;  %v393_v51 = vpop.f32.mrf.mxu1 }
 0x10f   :  { %v1207_v52 = vpop.f32.mrf.mxu0  ;;  %v394_v54 = vadd.f32 %v1677_v42, %v393_v51 }
 0x110   :  { %vm296_vm2 = vcmp.gt.f32.partialorder %v197_v49, 0.5  ;;  %v403_v53 = vadd.f32 %v391_v45, %v197_v49  ;;  %v1239_v56 = vpop.f32.mrf.mxu1  ;;  %v208_v14 = vadd.f32 %v1207_v52, %v1683_v46 }
 0x111   :  { %v1059_v55 = vsel %vm296_vm2, 1.0, %v1544_v0  ;;  %v199_v57 = vpop.f32.mrf.mxu0  ;;  %vm398_vm3 = vcmp.gt.f32.partialorder %v394_v54, 0.5 }
 0x112   :  { %v1689_v58 = vadd.f32 %v1070_v50, %v1059_v55  ;;  %v200_v59 = vadd.f32 %v1683_v46, %v199_v57  ;;  %v415_v60 = vmul.f32 0.2, %v403_v53  ;;  %v1071_v63 = vsel %vm398_vm3, 1.0, %v1544_v0 }
 0x113   :  { %v1722_v20 = vpop.f32.mrf.mxu0 }
 0x114   :  { %409 = vst [vmem:[#allocation9] sm:$0xff] %v1689_v58  ;;  %v417_v61 = vsub.f32 1.0, %v1689_v58  ;;  %vm297_vm4 = vcmp.gt.f32.partialorder %v200_v59, 0.5  ;;  %v404_v62 = vadd.f32 %v394_v54, %v200_v59  ;;  %v411_v30 = vmul.f32 0.5, %v1689_v58 }
 0x115   :  { %v1060_v1 = vsel %vm297_vm4, 1.0, %v1544_v0  ;;  %v212_v21 = vpop.f32.mrf.mxu0 }
 0x116   :  { %v419_v5 = vmul.f32 %v417_v61, %v415_v60  ;;  %v1697_v7 = vadd.f32 %v1071_v63, %v1060_v1  ;;  %v416_v9 = vmul.f32 0.2, %v404_v62  ;;  %v426_v32 = vmul.f32 0.1, %v411_v30 }
 0x117   :  { %v1724_v22 = vpop.f32.mrf.mxu0  ;;  %v493_v55 = vmul.f32 0.9, %v411_v30  ;;  %v213_v57 = vadd.f32 %v1683_v46, %v212_v21 }
 0x118   :  { %410 = vst [vmem:[#allocation9 + $0x8] sm:$0xff] %v1697_v7  ;;  %v418_v11 = vsub.f32 1.0, %v1697_v7  ;;  %v436_v12 = vpack.c.bf16 %v1697_v7, %v1689_v58  ;;  %v424_v13 = vadd.f32 %v419_v5, %v205_v3  ;;  %v412_v33 = vmul.f32 0.5, %v1697_v7 }
 0x119   :  { %v215_v23 = vpop.f32.mrf.mxu0 }
 0x11a   :  { %v420_v16 = vmul.f32 %v418_v11, %v416_v9  ;;  %1257 = vmatmul.mubr.bf16.vlgmr.msra.gmra.mxu0 %v436_v12  ;;  %v428_v34 = vsub.f32 %v424_v13, %v426_v32  ;;  %v427_v36 = vmul.f32 0.1, %v412_v33  ;;  %v494_v9 = vmul.f32 0.9, %v412_v33 }
 0x11b   :  { %1281 = vmatpush3.bf16.msra.mxu0 %v1605_v2  ;;  %1296 = vmatprep.mubr.msk.bf16.mxu0 %vm1545_vm0, %v1544_v0  ;;  %v1726_v24 = vpop.f32.mrf.mxu0  ;;  %v216_v12 = vadd.f32 %v1683_v46, %v215_v23 }
 0x11c   :  { %v425_v18 = vadd.f32 %v420_v16, %v208_v14  ;;  %1282 = vmatprep.subr.bf16.mxu0 %v1544_v0  ;;  %vm430_vm5 = vcmp.gt.f32.partialorder %v428_v34, 0.5 }
 0x11d   :  { %v1728_v25 = vpop.f32.mrf.mxu0  ;;  %v1072_v43 = vsel %vm430_vm5, 1.0, %v1544_v0 }
 0x11e   :  { %v429_v39 = vsub.f32 %v425_v18, %v427_v36 }
 0x11f   :  { %1283 = vmatpush3.bf16.msra.mxu0 %v1608_v4  ;;  %v1730_v26 = vpop.f32.mrf.mxu0 }
 0x120   :  { %1284 = vmatprep.subr.bf16.mxu0 %v1544_v0  ;;  %vm431_vm7 = vcmp.gt.f32.partialorder %v429_v39, 0.5 }
 0x121   :  { %v1732_v27 = vpop.f32.mrf.mxu0  ;;  %v1073_v53 = vsel %vm431_vm7, 1.0, %v1544_v0 }
 0x123   :  { %1285 = vmatpush3.bf16.msra.mxu0 %v1612_v6  ;;  %v1734_v28 = vpop.f32.mrf.mxu0 }
 0x124   :  { %1286 = vmatprep.subr.bf16.mxu0 %v1544_v0 }
 0x125   :  { %v1736_v29 = vpop.f32.mrf.mxu0 }
 0x127   :  { %1287 = vmatpush3.bf16.msra.mxu0 %v1616_v8  ;;  %v1739_v31 = vpop.f32.mrf.mxu0 }
 0x128   :  { %1288 = vmatprep.subr.bf16.mxu0 %v1544_v0 }
 0x129   :  { %v1742_v35 = vpop.f32.mrf.mxu0 }
 0x12b   :  { %1289 = vmatpush3.bf16.msra.mxu0 %v1620_v10 }
 0x12c   :  { %1290 = vmatprep.subr.bf16.mxu0 %v1544_v0 }
 0x12f   :  { %1291 = vmatpush3.bf16.msra.mxu0 %v1624_v15 }
 0x130   :  { %1292 = vmatprep.subr.bf16.mxu0 %v1544_v0 }
 0x133   :  { %1293 = vmatpush3.bf16.msra.mxu0 %v1628_v17 }
 0x134   :  { %1294 = vmatprep.subr.bf16.mxu0 %v1544_v0 }
 0x137   :  { %1295 = vmatpush3.bf16.msra.mxu0 %v1632_v19 }
 0x138   :  { %1320 = vmatprep.subr.bf16.mxu0 %v1544_v0 }
 0x1da   :  { %v471_v37 = vpop.f32.mrf.mxu0 }
 0x1db   :  { %v472_v38 = vadd.f32 %v1677_v42, %v471_v37 }
 0x1dc   :  { %v1258_v40 = vpop.f32.mrf.mxu0 }
 0x1dd   :  { %vm478_vm6 = vcmp.gt.f32.partialorder %v472_v38, 0.5  ;;  %v484_v41 = vadd.f32 %v472_v38, %v428_v34 }
 0x1de   :  { %v1074_v44 = vsel %vm478_vm6, 1.0, %v1544_v0  ;;  %v474_v45 = vpop.f32.mrf.mxu0 }
 0x1df   :  { %v486_v47 = vadd.f32 %v1074_v44, %v1072_v43  ;;  %v475_v48 = vadd.f32 %v1677_v42, %v474_v45  ;;  %v499_v50 = vmul.f32 0.2, %v484_v41 }
 0x1e0   :  { %v1259_v49 = vpop.f32.mrf.mxu0 }
 0x1e1   :  { %491 = vst [vmem:[#allocation9 + $0x10] sm:$0xff] %v486_v47  ;;  %v501_v51 = vsub.f32 1.0, %v486_v47  ;;  %vm479_vm8 = vcmp.gt.f32.partialorder %v475_v48, 0.5  ;;  %v485_v52 = vadd.f32 %v475_v48, %v429_v39  ;;  %v495_v56 = vmul.f32 0.5, %v486_v47 }
 0x1e2   :  { %v1075_v54 = vsel %vm479_vm8, 1.0, %v1544_v0  ;;  %v488_v41 = vadd.f32 %v486_v47, %v1689_v58 }
 0x1e3   :  { %v503_v59 = vmul.f32 %v501_v51, %v499_v50  ;;  %v1751_v60 = vadd.f32 %v1075_v54, %v1073_v53  ;;  %v497_v61 = vadd.f32 %v495_v56, %v493_v55  ;;  %v500_v62 = vmul.f32 0.2, %v485_v52 }
 0x1e4   :  { %v221_v54 = vadd.f32 %v1722_v20, %v1683_v46 }
 0x1e5   :  { %492 = vst [vmem:[#allocation9 + $0x18] sm:$0xff] %v1751_v60  ;;  %v502_v63 = vsub.f32 1.0, %v1751_v60  ;;  %v520_v1 = vpack.c.bf16 %v1751_v60, %v486_v47  ;;  %v508_v3 = vadd.f32 %v503_v59, %v213_v57  ;;  %v510_v5 = vmul.f32 0.1, %v497_v61 }
 0x1e6   :  { %v496_v11 = vmul.f32 0.5, %v1751_v60  ;;  %v577_v45 = vmul.f32 0.9, %v497_v61  ;;  %v489_v58 = vadd.f32 %v1751_v60, %v1697_v7 }
 0x1e7   :  { %v504_v13 = vmul.f32 %v502_v63, %v500_v62  ;;  %1277 = vmatmul.mubr.bf16.vlgmr.msra.gmra.mxu1 %v520_v1  ;;  %v512_v14 = vsub.f32 %v508_v3, %v510_v5 }
 0x1e8   :  { %v498_v16 = vadd.f32 %v496_v11, %v494_v9  ;;  %1301 = vmatpush3.bf16.msra.mxu1 %v1605_v2  ;;  %1316 = vmatprep.mubr.msk.bf16.mxu1 %vm1545_vm0, %v1544_v0  ;;  %v224_v9 = vadd.f32 %v1724_v22, %v1683_v46 }
 0x1e9   :  { %v509_v18 = vadd.f32 %v504_v13, %v216_v12  ;;  %1302 = vmatprep.subr.bf16.mxu1 %v1544_v0  ;;  %vm514_vm9 = vcmp.gt.f32.partialorder %v512_v14, 0.5 }
 0x1ea   :  { %v511_v21 = vmul.f32 0.1, %v498_v16  ;;  %v1076_v36 = vsel %vm514_vm9, 1.0, %v1544_v0  ;;  %v578_v1 = vmul.f32 0.9, %v498_v16 }
 0x1ec   :  { %v513_v30 = vsub.f32 %v509_v18, %v511_v21  ;;  %1303 = vmatpush3.bf16.msra.mxu1 %v1608_v4 }
 0x1ed   :  { %1304 = vmatprep.subr.bf16.mxu1 %v1544_v0 }
 0x1ee   :  { %vm515_vm11 = vcmp.gt.f32.partialorder %v513_v30, 0.5 }
 0x1ef   :  { %v1077_v51 = vsel %vm515_vm11, 1.0, %v1544_v0 }
 0x1f0   :  { %1305 = vmatpush3.bf16.msra.mxu1 %v1612_v6 }
 0x1f1   :  { %1306 = vmatprep.subr.bf16.mxu1 %v1544_v0 }
 0x1f4   :  { %1307 = vmatpush3.bf16.msra.mxu1 %v1616_v8 }
 0x1f5   :  { %1308 = vmatprep.subr.bf16.mxu1 %v1544_v0 }
 0x1f8   :  { %1309 = vmatpush3.bf16.msra.mxu1 %v1620_v10 }
 0x1f9   :  { %1310 = vmatprep.subr.bf16.mxu1 %v1544_v0 }
 0x1fc   :  { %1311 = vmatpush3.bf16.msra.mxu1 %v1624_v15 }
 0x1fd   :  { %1312 = vmatprep.subr.bf16.mxu1 %v1544_v0 }
 0x200   :  { %1313 = vmatpush3.bf16.msra.mxu1 %v1628_v17 }
 0x201   :  { %1314 = vmatprep.subr.bf16.mxu1 %v1544_v0 }
 0x204   :  { %1315 = vmatpush3.bf16.msra.mxu1 %v1632_v19 }
 0x205   :  { %1340 = vmatprep.subr.bf16.mxu1 %v1544_v0 }
 0x2a7   :  { %v555_v23 = vpop.f32.mrf.mxu1 }
 0x2a8   :  { %v556_v32 = vadd.f32 %v1677_v42, %v555_v23 }
 0x2a9   :  { %v1278_v33 = vpop.f32.mrf.mxu1 }
 0x2aa   :  { %vm562_vm10 = vcmp.gt.f32.partialorder %v556_v32, 0.5  ;;  %v568_v34 = vadd.f32 %v556_v32, %v512_v14 }
 0x2ab   :  { %v1078_v37 = vsel %vm562_vm10, 1.0, %v1544_v0  ;;  %v558_v38 = vpop.f32.mrf.mxu1 }
 0x2ac   :  { %v570_v39 = vadd.f32 %v1078_v37, %v1076_v36  ;;  %v559_v40 = vadd.f32 %v1677_v42, %v558_v38  ;;  %v583_v43 = vmul.f32 0.2, %v568_v34 }
 0x2ad   :  { %v1279_v44 = vpop.f32.mrf.mxu1 }
 0x2ae   :  { %575 = vst [vmem:[#allocation9 + $0x20] sm:$0xff] %v570_v39  ;;  %v585_v48 = vsub.f32 1.0, %v570_v39  ;;  %vm563_vm12 = vcmp.gt.f32.partialorder %v559_v40, 0.5  ;;  %v569_v49 = vadd.f32 %v559_v40, %v513_v30  ;;  %v579_v50 = vmul.f32 0.5, %v570_v39 }
 0x2af   :  { %v1079_v52 = vsel %vm563_vm12, 1.0, %v1544_v0  ;;  %v572_v53 = vadd.f32 %v570_v39, %v488_v41 }
 0x2b0   :  { %v587_v55 = vmul.f32 %v585_v48, %v583_v43  ;;  %v571_v56 = vadd.f32 %v1079_v52, %v1077_v51  ;;  %v581_v57 = vadd.f32 %v579_v50, %v577_v45  ;;  %v584_v47 = vmul.f32 0.2, %v569_v49 }
 0x2b1   :  { %v229_v45 = vadd.f32 %v1683_v46, %v1728_v25 }
 0x2b2   :  { %576 = vst [vmem:[#allocation9 + $0x28] sm:$0xff] %v571_v56  ;;  %v586_v59 = vsub.f32 1.0, %v571_v56  ;;  %v604_v61 = vpack.c.bf16 %v571_v56, %v570_v39  ;;  %v592_v62 = vadd.f32 %v587_v55, %v221_v54  ;;  %v594_v63 = vmul.f32 0.1, %v581_v57 }
 0x2b3   :  { %v580_v3 = vmul.f32 0.5, %v571_v56  ;;  %v573_v5 = vadd.f32 %v571_v56, %v489_v58  ;;  %v661_v37 = vmul.f32 0.9, %v581_v57 }
 0x2b4   :  { %v588_v11 = vmul.f32 %v586_v59, %v584_v47  ;;  %1297 = vmatmul.mubr.bf16.vlgmr.msra.gmra.mxu0 %v604_v61  ;;  %v596_v20 = vsub.f32 %v592_v62, %v594_v63  ;;  %v232_v59 = vadd.f32 %v1683_v46, %v1732_v27 }
 0x2b5   :  { %v582_v12 = vadd.f32 %v580_v3, %v578_v1  ;;  %1321 = vmatpush3.bf16.msra.mxu0 %v1605_v2  ;;  %1336 = vmatprep.mubr.msk.bf16.mxu0 %vm1545_vm0, %v1544_v0 }
 0x2b6   :  { %v593_v7 = vadd.f32 %v588_v11, %v224_v9  ;;  %1322 = vmatprep.subr.bf16.mxu0 %v1544_v0  ;;  %vm598_vm13 = vcmp.gt.f32.partialorder %v596_v20, 0.5 }
 0x2b7   :  { %v595_v60 = vmul.f32 0.1, %v582_v12  ;;  %v1080_v21 = vsel %vm598_vm13, 1.0, %v1544_v0  ;;  %v662_v57 = vmul.f32 0.9, %v582_v12 }
 0x2b9   :  { %v597_v13 = vsub.f32 %v593_v7, %v595_v60  ;;  %1323 = vmatpush3.bf16.msra.mxu0 %v1608_v4 }
 0x2ba   :  { %1324 = vmatprep.subr.bf16.mxu0 %v1544_v0 }
 0x2bb   :  { %vm599_vm15 = vcmp.gt.f32.partialorder %v597_v13, 0.5 }
 0x2bc   :  { %v1081_v41 = vsel %vm599_vm15, 1.0, %v1544_v0 }
 0x2bd   :  { %1325 = vmatpush3.bf16.msra.mxu0 %v1612_v6 }
 0x2be   :  { %1326 = vmatprep.subr.bf16.mxu0 %v1544_v0 }
 0x2c1   :  { %1327 = vmatpush3.bf16.msra.mxu0 %v1616_v8 }
 0x2c2   :  { %1328 = vmatprep.subr.bf16.mxu0 %v1544_v0 }
 0x2c5   :  { %1329 = vmatpush3.bf16.msra.mxu0 %v1620_v10 }
 0x2c6   :  { %1330 = vmatprep.subr.bf16.mxu0 %v1544_v0 }
 0x2c9   :  { %1331 = vmatpush3.bf16.msra.mxu0 %v1624_v15 }
 0x2ca   :  { %1332 = vmatprep.subr.bf16.mxu0 %v1544_v0 }
 0x2cd   :  { %1333 = vmatpush3.bf16.msra.mxu0 %v1628_v17 }
 0x2ce   :  { %1334 = vmatprep.subr.bf16.mxu0 %v1544_v0 }
 0x2d1   :  { %1335 = vmatpush3.bf16.msra.mxu0 %v1632_v19 }
 0x2d2   :  { %1360 = vmatprep.subr.bf16.mxu0 %v1544_v0 }
 0x374   :  { %v639_v22 = vpop.f32.mrf.mxu0 }
 0x375   :  { %v640_v14 = vadd.f32 %v1677_v42, %v639_v22 }
 0x376   :  { %v1298_v16 = vpop.f32.mrf.mxu0 }
 0x377   :  { %vm646_vm14 = vcmp.gt.f32.partialorder %v640_v14, 0.5  ;;  %v652_v18 = vadd.f32 %v640_v14, %v596_v20 }
 0x378   :  { %v1082_v30 = vsel %vm646_vm14, 1.0, %v1544_v0  ;;  %v642_v23 = vpop.f32.mrf.mxu0 }
 0x379   :  { %v654_v32 = vadd.f32 %v1082_v30, %v1080_v21  ;;  %v643_v33 = vadd.f32 %v1677_v42, %v642_v23  ;;  %v667_v34 = vmul.f32 0.2, %v652_v18 }
 0x37a   :  { %v1299_v36 = vpop.f32.mrf.mxu0 }
 0x37b   :  { %659 = vst [vmem:[#allocation9 + $0x30] sm:$0xff] %v654_v32  ;;  %v669_v38 = vsub.f32 1.0, %v654_v32  ;;  %vm647_vm1 = vcmp.gt.f32.partialorder %v643_v33, 0.5  ;;  %v653_v39 = vadd.f32 %v643_v33, %v597_v13  ;;  %v663_v40 = vmul.f32 0.5, %v654_v32 }
 0x37c   :  { %v1083_v43 = vsel %vm647_vm1, 1.0, %v1544_v0  ;;  %v656_v44 = vadd.f32 %v654_v32, %v572_v53  ;;  %v237_v33 = vadd.f32 %v1726_v24, %v1683_v46 }
 0x37d   :  { %v671_v48 = vmul.f32 %v669_v38, %v667_v34  ;;  %v655_v49 = vadd.f32 %v1083_v43, %v1081_v41  ;;  %v665_v50 = vadd.f32 %v663_v40, %v661_v37  ;;  %v668_v51 = vmul.f32 0.2, %v653_v39 }
 0x37f   :  { %660 = vst [vmem:[#allocation9 + $0x38] sm:$0xff] %v655_v49  ;;  %v670_v52 = vsub.f32 1.0, %v655_v49  ;;  %v688_v54 = vpack.c.bf16 %v655_v49, %v654_v32  ;;  %v676_v55 = vadd.f32 %v671_v48, %v229_v45  ;;  %v678_v56 = vmul.f32 0.1, %v665_v50 }
 0x380   :  { %v664_v58 = vmul.f32 0.5, %v655_v49  ;;  %v657_v47 = vadd.f32 %v655_v49, %v573_v5  ;;  %v745_v14 = vmul.f32 0.9, %v665_v50  ;;  %v240_v50 = vadd.f32 %v1730_v26, %v1683_v46 }
 0x381   :  { %v672_v61 = vmul.f32 %v670_v52, %v668_v51  ;;  %1317 = vmatmul.mubr.bf16.vlgmr.msra.gmra.mxu1 %v688_v54  ;;  %v680_v53 = vsub.f32 %v676_v55, %v678_v56 }
 0x382   :  { %v666_v62 = vadd.f32 %v664_v58, %v662_v57  ;;  %1341 = vmatpush3.bf16.msra.mxu1 %v1605_v2  ;;  %1356 = vmatprep.mubr.msk.bf16.mxu1 %vm1545_vm0, %v1544_v0 }
 0x383   :  { %v677_v25 = vadd.f32 %v672_v61, %v232_v59  ;;  %1342 = vmatprep.subr.bf16.mxu1 %v1544_v0  ;;  %vm682_vm2 = vcmp.gt.f32.partialorder %v680_v53, 0.5 }
 0x384   :  { %v679_v63 = vmul.f32 0.1, %v666_v62  ;;  %v1084_v11 = vsel %vm682_vm2, 1.0, %v1544_v0  ;;  %v746_v45 = vmul.f32 0.9, %v666_v62 }
 0x386   :  { %v681_v1 = vsub.f32 %v677_v25, %v679_v63  ;;  %1343 = vmatpush3.bf16.msra.mxu1 %v1608_v4  ;;  %v245_v63 = vadd.f32 %v1683_v46, %v1736_v29 }
 0x387   :  { %1344 = vmatprep.subr.bf16.mxu1 %v1544_v0 }
 0x388   :  { %vm683_vm4 = vcmp.gt.f32.partialorder %v681_v1, 0.5 }
 0x389   :  { %v1085_v30 = vsel %vm683_vm4, 1.0, %v1544_v0 }
 0x38a   :  { %1345 = vmatpush3.bf16.msra.mxu1 %v1612_v6 }
 0x38b   :  { %1346 = vmatprep.subr.bf16.mxu1 %v1544_v0 }
 0x38e   :  { %1347 = vmatpush3.bf16.msra.mxu1 %v1616_v8 }
 0x38f   :  { %1348 = vmatprep.subr.bf16.mxu1 %v1544_v0 }
 0x392   :  { %1349 = vmatpush3.bf16.msra.mxu1 %v1620_v10 }
 0x393   :  { %1350 = vmatprep.subr.bf16.mxu1 %v1544_v0 }
 0x396   :  { %1351 = vmatpush3.bf16.msra.mxu1 %v1624_v15 }
 0x397   :  { %1352 = vmatprep.subr.bf16.mxu1 %v1544_v0 }
 0x39a   :  { %1353 = vmatpush3.bf16.msra.mxu1 %v1628_v17 }
 0x39b   :  { %1354 = vmatprep.subr.bf16.mxu1 %v1544_v0 }
 0x39e   :  { %1355 = vmatpush3.bf16.msra.mxu1 %v1632_v19 }
 0x441   :  { %v723_v27 = vpop.f32.mrf.mxu1 }
 0x442   :  { %v724_v3 = vadd.f32 %v1677_v42, %v723_v27 }
 0x443   :  { %v1318_v5 = vpop.f32.mrf.mxu1 }
 0x444   :  { %vm730_vm3 = vcmp.gt.f32.partialorder %v724_v3, 0.5  ;;  %v736_v9 = vadd.f32 %v724_v3, %v680_v53 }
 0x445   :  { %v1086_v20 = vsel %vm730_vm3, 1.0, %v1544_v0  ;;  %v726_v12 = vpop.f32.mrf.mxu1 }
 0x446   :  { %v738_v7 = vadd.f32 %v1086_v20, %v1084_v11  ;;  %v727_v60 = vadd.f32 %v1677_v42, %v726_v12  ;;  %v751_v13 = vmul.f32 0.2, %v736_v9 }
 0x447   :  { %v1319_v22 = vpop.f32.mrf.mxu1 }
 0x448   :  { %743 = vst [vmem:[#allocation9 + $0x40] sm:$0xff] %v738_v7  ;;  %v753_v16 = vsub.f32 1.0, %v738_v7  ;;  %vm731_vm5 = vcmp.gt.f32.partialorder %v727_v60, 0.5  ;;  %v737_v18 = vadd.f32 %v727_v60, %v681_v1  ;;  %v747_v21 = vmul.f32 0.5, %v738_v7 }
 0x449   :  { %v1087_v23 = vsel %vm731_vm5, 1.0, %v1544_v0  ;;  %v740_v32 = vadd.f32 %v738_v7, %v656_v44  ;;  %v248_v22 = vadd.f32 %v1683_v46, %v1742_v35 }
 0x44a   :  { %v755_v34 = vmul.f32 %v753_v16, %v751_v13  ;;  %v739_v36 = vadd.f32 %v1087_v23, %v1085_v30  ;;  %v749_v37 = vadd.f32 %v747_v21, %v745_v14  ;;  %v752_v38 = vmul.f32 0.2, %v737_v18 }
 0x44c   :  { %744 = vst [vmem:[#allocation9 + $0x48] sm:$0xff] %v739_v36  ;;  %v754_v39 = vsub.f32 1.0, %v739_v36  ;;  %v772_v40 = vpack.c.bf16 %v739_v36, %v738_v7  ;;  %v760_v41 = vadd.f32 %v755_v34, %v237_v33  ;;  %v762_v43 = vmul.f32 0.1, %v749_v37 }
 0x44d   :  { %v748_v48 = vmul.f32 0.5, %v739_v36  ;;  %v741_v49 = vadd.f32 %v739_v36, %v657_v47  ;;  %v829_v47 = vmul.f32 0.9, %v749_v37 }
 0x44e   :  { %v756_v51 = vmul.f32 %v754_v39, %v752_v38  ;;  %1337 = vmatmul.mubr.bf16.vlgmr.msra.gmra.mxu0 %v772_v40  ;;  %v764_v44 = vsub.f32 %v760_v41, %v762_v43 }
 0x44f   :  { %v750_v52 = vadd.f32 %v748_v48, %v746_v45  ;;  %1361 = vmatpush3.bf16.msra.mxu0 %v1605_v2  ;;  %1376 = vmatprep.mubr.msk.bf16.mxu0 %vm1545_vm0, %v1544_v0 }
 0x450   :  { %v761_v24 = vadd.f32 %v756_v51, %v240_v50  ;;  %1362 = vmatprep.subr.bf16.mxu0 %v1544_v0  ;;  %vm766_vm0 = vcmp.gt.f32.partialorder %v764_v44, 0.5 }
 0x451   :  { %v763_v54 = vmul.f32 0.1, %v750_v52  ;;  %v830_v7 = vmul.f32 0.9, %v750_v52  ;;  %v253_v52 = vadd.f32 %v1734_v28, %v1683_v46 }
 0x453   :  { %v765_v55 = vsub.f32 %v761_v24, %v763_v54  ;;  %1363 = vmatpush3.bf16.msra.mxu0 %v1608_v4 }
 0x454   :  { %1364 = vmatprep.subr.bf16.mxu0 %v1544_v0 }
 0x455   :  { %vm767_vm7 = vcmp.gt.f32.partialorder %v765_v55, 0.5 }
 0x456   :  { %v1089_v53 = vsel %vm767_vm7, 1.0, %v1544_v0 }
 0x457   :  { %1365 = vmatpush3.bf16.msra.mxu0 %v1612_v6 }
 0x458   :  { %1366 = vmatprep.subr.bf16.mxu0 %v1544_v0 }
 0x45b   :  { %1367 = vmatpush3.bf16.msra.mxu0 %v1616_v8 }
 0x45c   :  { %1368 = vmatprep.subr.bf16.mxu0 %v1544_v0 }
 0x45f   :  { %1369 = vmatpush3.bf16.msra.mxu0 %v1620_v10  ;;  %v1088_v10 = vsel %vm766_vm0, 1.0, %v1544_v0 }
 0x460   :  { %1370 = vmatprep.subr.bf16.mxu0 %v1544_v0 }
 0x463   :  { %1371 = vmatpush3.bf16.msra.mxu0 %v1624_v15 }
 0x464   :  { %1372 = vmatprep.subr.bf16.mxu0 %v1544_v0 }
 0x467   :  { %1373 = vmatpush3.bf16.msra.mxu0 %v1628_v17 }
 0x468   :  { %1374 = vmatprep.subr.bf16.mxu0 %v1544_v0 }
 0x46b   :  { %1375 = vmatpush3.bf16.msra.mxu0 %v1632_v19 }
 0x50e   :  { %v807_v2 = vpop.f32.mrf.mxu0 }
 0x50f   :  { %v808_v4 = vadd.f32 %v1677_v42, %v807_v2 }
 0x510   :  { %v1338_v6 = vpop.f32.mrf.mxu0 }
 0x511   :  { %vm814_vm6 = vcmp.gt.f32.partialorder %v808_v4, 0.5  ;;  %v820_v8 = vadd.f32 %v808_v4, %v764_v44 }
 0x512   :  { %v1090_v26 = vsel %vm814_vm6, 1.0, %v1544_v0  ;;  %v810_v15 = vpop.f32.mrf.mxu0 }
 0x513   :  { %v822_v56 = vadd.f32 %v1090_v26, %v1088_v10  ;;  %v811_v17 = vadd.f32 %v1677_v42, %v810_v15  ;;  %v835_v57 = vmul.f32 0.2, %v820_v8 }
 0x514   :  { %v1339_v58 = vpop.f32.mrf.mxu0 }
 0x515   :  { %827 = vst [vmem:[#allocation9 + $0x50] sm:$0xff] %v822_v56  ;;  %v837_v19 = vsub.f32 1.0, %v822_v56  ;;  %vm815_vm8 = vcmp.gt.f32.partialorder %v811_v17, 0.5  ;;  %v821_v59 = vadd.f32 %v811_v17, %v765_v55  ;;  %v831_v61 = vmul.f32 0.5, %v822_v56 }
 0x516   :  { %v1091_v62 = vsel %vm815_vm8, 1.0, %v1544_v0  ;;  %v824_v25 = vadd.f32 %v822_v56, %v740_v32  ;;  %v256_v17 = vadd.f32 %v1739_v31, %v1683_v46 }
 0x517   :  { %v839_v1 = vmul.f32 %v837_v19, %v835_v57  ;;  %v823_v27 = vadd.f32 %v1091_v62, %v1089_v53  ;;  %v833_v3 = vadd.f32 %v831_v61, %v829_v47  ;;  %v836_v5 = vmul.f32 0.2, %v821_v59 }
 0x519   :  { %828 = vst [vmem:[#allocation9 + $0x58] sm:$0xff] %v823_v27  ;;  %v838_v9 = vsub.f32 1.0, %v823_v27  ;;  %v856_v11 = vpack.c.bf16 %v823_v27, %v822_v56  ;;  %v844_v20 = vadd.f32 %v839_v1, %v245_v63  ;;  %v846_v12 = vmul.f32 0.1, %v833_v3 }
 0x51a   :  { %v832_v60 = vmul.f32 0.5, %v823_v27  ;;  %v825_v13 = vadd.f32 %v823_v27, %v741_v49  ;;  %v913_v51 = vmul.f32 0.9, %v833_v3 }
 0x51b   :  { %v840_v14 = vmul.f32 %v838_v9, %v836_v5  ;;  %1357 = vmatmul.mubr.bf16.vlgmr.msra.gmra.mxu1 %v856_v11  ;;  %v848_v16 = vsub.f32 %v844_v20, %v846_v12 }
 0x51c   :  { %v834_v18 = vadd.f32 %v832_v60, %v830_v7 }
 0x51d   :  { %v845_v29 = vadd.f32 %v840_v14, %v248_v22  ;;  %vm850_vm9 = vcmp.gt.f32.partialorder %v848_v16, 0.5 }
 0x51e   :  { %v847_v21 = vmul.f32 0.1, %v834_v18  ;;  %v1092_v36 = vsel %vm850_vm9, 1.0, %v1544_v0  ;;  %v914_v15 = vmul.f32 0.9, %v834_v18 }
 0x520   :  { %v849_v30 = vsub.f32 %v845_v29, %v847_v21 }
 0x522   :  { %vm851_vm11 = vcmp.gt.f32.partialorder %v849_v30, 0.5 }
 0x523   :  { %v1093_v49 = vsel %vm851_vm11, 1.0, %v1544_v0 }
 0x5db   :  { %v891_v23 = vpop.f32.mrf.mxu1 }
 0x5dc   :  { %v892_v32 = vadd.f32 %v1677_v42, %v891_v23 }
 0x5dd   :  { %v1358_v33 = vpop.f32.mrf.mxu1 }
 0x5de   :  { %vm898_vm10 = vcmp.gt.f32.partialorder %v892_v32, 0.5  ;;  %v904_v34 = vadd.f32 %v892_v32, %v848_v16 }
 0x5df   :  { %v1094_v37 = vsel %vm898_vm10, 1.0, %v1544_v0  ;;  %v894_v38 = vpop.f32.mrf.mxu1 }
 0x5e0   :  { %v906_v35 = vadd.f32 %v1094_v37, %v1092_v36  ;;  %v895_v39 = vadd.f32 %v1677_v42, %v894_v38  ;;  %v919_v40 = vmul.f32 0.2, %v904_v34 }
 0x5e1   :  { %v1359_v41 = vpop.f32.mrf.mxu1 }
 0x5e2   :  { %911 = vst [vmem:[#allocation9 + $0x60] sm:$0xff] %v906_v35  ;;  %v921_v43 = vsub.f32 1.0, %v906_v35  ;;  %vm899_vm12 = vcmp.gt.f32.partialorder %v895_v39, 0.5  ;;  %v905_v45 = vadd.f32 %v895_v39, %v849_v30  ;;  %v908_v48 = vadd.f32 %v906_v35, %v824_v25 }
 0x5e3   :  { %v1095_v50 = vsel %vm899_vm12, 1.0, %v1544_v0  ;;  %v915_v44 = vmul.f32 0.5, %v906_v35 }
 0x5e4   :  { %v923_v24 = vmul.f32 %v921_v43, %v919_v40  ;;  %v907_v54 = vadd.f32 %v1095_v50, %v1093_v49  ;;  %v920_v55 = vmul.f32 0.2, %v905_v45 }
 0x5e5   :  { %v917_v2 = vadd.f32 %v915_v44, %v913_v51 }
 0x5e6   :  { %912 = vst [vmem:[#allocation9 + $0x68] sm:$0xff] %v907_v54  ;;  %v922_v4 = vsub.f32 1.0, %v907_v54  ;;  %v940_v6 = vpack.c.bf16 %v907_v54, %v906_v35  ;;  %v928_v8 = vadd.f32 %v923_v24, %v253_v52  ;;  %v909_v10 = vadd.f32 %v907_v54, %v825_v13 }
 0x5e7   :  { %v930_v26 = vmul.f32 0.1, %v917_v2  ;;  %v916_v56 = vmul.f32 0.5, %v907_v54 }
 0x5e8   :  { %v924_v57 = vmul.f32 %v922_v4, %v920_v55  ;;  %1377 = vmatmul.mubr.bf16.vlgmr.msra.gmra.mxu0 %v940_v6 }
 0x5e9   :  { %v932_v58 = vsub.f32 %v928_v8, %v930_v26  ;;  %v918_v47 = vadd.f32 %v916_v56, %v914_v15 }
 0x5ea   :  { %v929_v28 = vadd.f32 %v924_v57, %v256_v17 }
 0x5eb   :  { %v931_v19 = vmul.f32 0.1, %v918_v47  ;;  %vm934_vm13 = vcmp.gt.f32.partialorder %v932_v58, 0.5 }
 0x5ec   :  { %v1096_v63 = vsel %vm934_vm13, 1.0, %v1544_v0 }
 0x5ed   :  { %v933_v59 = vsub.f32 %v929_v28, %v931_v19 }
 0x5ef   :  { %vm935_vm15 = vcmp.gt.f32.partialorder %v933_v59, 0.5 }
 0x5f0   :  { %v1097_v11 = vsel %vm935_vm15, 1.0, %v1544_v0 }
 0x6a8   :  { %v975_v61 = vpop.f32.mrf.mxu0 }
 0x6a9   :  { %v976_v53 = vadd.f32 %v1677_v42, %v975_v61 }
 0x6aa   :  { %v1378_v62 = vpop.f32.mrf.mxu0 }
 0x6ab   :  { %vm982_vm14 = vcmp.gt.f32.partialorder %v976_v53, 0.5  ;;  %v988_v25 = vadd.f32 %v976_v53, %v932_v58 }
 0x6ac   :  { %v1098_v1 = vsel %vm982_vm14, 1.0, %v1544_v0  ;;  %v978_v27 = vpop.f32.mrf.mxu0 }
 0x6ad   :  { %v990_v46 = vadd.f32 %v1098_v1, %v1096_v63  ;;  %997 = vst [vmem:[#allocation10] sm:$0xff] %v988_v25  ;;  %v979_v31 = vadd.f32 %v1677_v42, %v978_v27 }
 0x6ae   :  { %v1379_v3 = vpop.f32.mrf.mxu0 }
 0x6af   :  { %v992_v5 = vadd.f32 %v990_v46, %v908_v48  ;;  %995 = vst [vmem:[#allocation9 + $0x70] sm:$0xff] %v990_v46  ;;  %vm983_vm1 = vcmp.gt.f32.partialorder %v979_v31, 0.5  ;;  %v989_v9 = vadd.f32 %v979_v31, %v933_v59 }
 0x6b0   :  { %v1099_v20 = vsel %vm983_vm1, 1.0, %v1544_v0 }
 0x6b1   :  { %999 = vst [vmem:[#allocation12] sm:$0xff] %v992_v5  ;;  %v991_v12 = vadd.f32 %v1099_v20, %v1097_v11  ;;  %998 = vst [vmem:[#allocation10 + $0x8] sm:$0xff] %v989_v9 }
 0x6b2   :  { %1480 = shalt.err (!%p1477_p5)
}
 0x6b3   :  { %1024 = dma.vmem_to_hbm [thread:$0]  %s1019_s4, 256, %s1911_s6, [#allocation11], %s1541_s11, %s1541_s11, %s1542_s12   ;;  %v993_v0 = vadd.f32 %v991_v12, %v909_v10  ;;  %996 = vst [vmem:[#allocation9 + $0x78] sm:$0xff] %v991_v12 }
 0x6b4   :  { %s1489_s28 = scalar_lea.vmem %s1007_s22, 2048  ;;  %p1494_p7 = scmp.lt.s32.totalorder %s1007_s22, %s1007_s22 }
 0x6b5   :  { %p1490_p6 = scmp.ne.s32.totalorder %s1007_s22, %s1489_s28  ;;  %p1495_p8 = scmp.lt.s32.totalorder %s1489_s28, %s1489_s28 }
 0x6b7   :  { %p1496_p9 = por %p1495_p8, %p1494_p7 }
 0x6b9   :  { %p1497_p10 = pnand %p1496_p9, %p1490_p6 }
 0x6bb   :  { %1500 = shalt.err (!%p1497_p10)
}
 0x6bc   :  { %1012 = dma.vmem_to_hbm [thread:$0]  %s1007_s22, 2048, %s1910_s5, [#allocation5], %s1541_s11, %s1541_s11, %s1542_s12   ;;  %1000 = vst [vmem:[#allocation12 + $0x8] sm:$0xff] %v993_v0 }
 0x6bd   :  { %s1509_s8 = scalar_lea.vmem %s1031_s24, 256  ;;  %p1514_p12 = scmp.lt.s32.totalorder %s1031_s24, %s1031_s24 }
 0x6be   :  { %p1510_p11 = scmp.ne.s32.totalorder %s1031_s24, %s1509_s8  ;;  %p1515_p13 = scmp.lt.s32.totalorder %s1509_s8, %s1509_s8 }
 0x6c0   :  { %p1516_p0 = por %p1515_p13, %p1514_p12 }
 0x6c2   :  { %p1517_p1 = pnand %p1516_p0, %p1510_p11 }
 0x6c4   :  { %1520 = shalt.err (!%p1517_p1)
}
 0x6c5   :  { %1036 = dma.vmem_to_hbm [thread:$0]  %s1031_s24, 256, %s1912_s7, [#allocation11], %s1541_s11, %s1541_s11, %s1542_s12  }
 0x6c6   :  { %1533 = dma.done.wait [#allocation5], 2048  }
 0x6c7   :  { %1534 = vsyncadd [#allocation5], 4294965248 }
 0x6c8   :  { %1535 = dma.done.wait [#allocation11], 512  }
 0x6c9   :  { %1536 = vsyncadd [#allocation11], 4294966784 }
 0x6ca   :  { %1046 = vsyncpa [#allocation4], 1 }
 0x6cb   :  { %1047 = vsyncpa [#allocation7], 1 }
 0x6cc   :  { %1048 = vsyncpa [#allocation5], 1 }
 0x6cd   :  { %1049 = vsyncpa [#allocation11], 1 }

</bundles_post_ra>
